<compile_context>
chip_gen: v6e
topology: v6e:2x2x1
jax: 0.10.0
libtpu: 0.0.40
codegen_flags: <defaults>
</compile_context>

<pallas_src>
import functools

import jax
import jax.numpy as jnp
from jax import lax
from jax.experimental import pallas as pl
from jax.experimental.pallas import tpu as pltpu


def _mpconv_kernel(x_ref, w_ref, o_ref, slab_ref, *, kh, kw, th, wo, row_stride):
    """One (batch, group, row-tile) grid step.

    x_ref:    (1, 1, 1, H_blk, Wp, Cin_pg)  padded image (resident) or halo window
    w_ref:    (1, Cout_pg, K)               tap-flattened, pre-scaled weights
    o_ref:    (1, 1, Cout_pg, TH*Wo)        lane-dense output tile
    slab_ref: (TH*Wo, K) VMEM scratch       im2col slab, K = kh*kw*Cin_pg
    """
    cin_pg = x_ref.shape[5]

    if row_stride:
        r0 = pl.program_id(2) * row_stride          # resident image: tile offset
        if row_stride % 8 == 0:
            r0 = pl.multiple_of(r0, 8)
    else:
        r0 = 0                                      # windowed fallback: window-local

    # Build the im2col slab once per tile.  K order = (dh, dw, cin), matching the
    # wrapper's weight flattening.  The (TH, Wo, Cin_pg) -> (TH*Wo, Cin_pg) reshape
    # only merges leading dims (lane dim unchanged).
    for dh in range(kh):
        for dw in range(kw):
            tap = dh * kw + dw
            xs = x_ref[0, 0, 0, pl.ds(r0 + dh, th), pl.ds(dw, wo), :]   # (TH, Wo, Cin_pg)
            slab_ref[:, tap * cin_pg:(tap + 1) * cin_pg] = xs.reshape(th * wo, cin_pg)

    # Single fused-K MXU matmul: (Cout_pg, K) x (TH*Wo, K)^T -> (Cout_pg, TH*Wo).
    # f32 accumulation stays inside the MXU; one lane-dense store + one cast per tile.
    acc = lax.dot_general(w_ref[0], slab_ref[...],
                          dimension_numbers=(((1,), (1,)), ((), ())),
                          preferred_element_type=jnp.float32)
    o_ref[0, 0] = acc.astype(o_ref.dtype)


def _pick_row_tile(ho, wo, bytes_per_out_row, *, target_m=512, budget_bytes=256 * 1024):
    """Pick TH.  Constraints: TH divides Ho and the out-block lane dim TH*Wo is a
    multiple of 128 (or the whole image).  Preference: per-tile slab/accumulator
    within ~256 KiB and M = TH*Wo in the MXU sweet spot (>= 256..512)."""
    valid = [d for d in range(1, ho + 1)
             if ho % d == 0 and (d == ho or (d * wo) % 128 == 0)]
    pool = [d for d in valid if d * bytes_per_out_row <= budget_bytes] or valid
    want_m = min(target_m, ho * wo)
    good = [d for d in pool if d * wo >= want_m]
    return min(good) if good else max(pool)


def mpconv1d_forward(x, weight, gain=1.0, groups=1, *,
                     mxu_dtype=jnp.bfloat16, row_tile=None, force_windowed=False):
    """x: (N, Cin, H, W) NCHW; weight: (Cout, Cin//groups, KH, KW).  Returns NCHW."""
    out_c, cin_pg, kh, kw = weight.shape
    n, c, h, w = x.shape
    assert c == cin_pg * groups and out_c % groups == 0
    assert kh <= 2, "module asserts kernel[0] <= 2 for the conv branch"
    cout_pg = out_c // groups
    out_dtype = x.dtype

    # MXU operand dtype: bf16 for f32 activations (f32 accumulation), else x.dtype.
    op_dtype = mxu_dtype if x.dtype == jnp.float32 else x.dtype
    itm = jnp.dtype(op_dtype).itemsize
    out_itm = jnp.dtype(out_dtype).itemsize

    # Eval-mode weight scaling  w * gain / sqrt(fan)  with fan = weight[0].numel().
    fan = cin_pg * kh * kw
    gain = jnp.asarray(gain, jnp.float32)
    w_s = weight.astype(jnp.float32) * (gain / fan ** 0.5)
    # Tap-flatten per group: (G, Cout_pg, K) with K order (dh, dw, cin).
    k_dim = kh * kw * cin_pg
    w2 = (w_s.reshape(groups, cout_pg, cin_pg, kh, kw)
             .transpose(0, 1, 3, 4, 2)
             .reshape(groups, cout_pg, k_dim)
             .astype(op_dtype))

    # ReflectionPad2d((kw//2, kw//2, 0, kh//2)).  Casting first lets XLA fuse the
    # bf16 cast into the pad so the kernel reads the narrow dtype from HBM.
    ph, pw = kh // 2, kw // 2
    x_c = x.astype(op_dtype)
    if ph or pw:
        x_pad = jnp.pad(x_c, ((0, 0), (0, 0), (0, ph), (pw, pw)), mode="reflect")
    else:
        x_pad = x_c
    hp, wp = h + ph, w + 2 * pw
    ho, wo = hp - kh + 1, wp - kw + 1

    # Row-tile size.
    if row_tile is None:
        bytes_per_out_row = wo * (k_dim * itm + 2 * cin_pg * itm
                                  + cout_pg * 4 + cout_pg * out_itm)
        th = _pick_row_tile(ho, wo, bytes_per_out_row)
    else:
        th = int(row_tile)
        assert ho % th == 0 and (th == ho or (th * wo) % 128 == 0), (th, ho, wo)
    nt = ho // th

    # Channels-last grouped layout (N, G, Hp, Wp, Cin/G): one wrapper layout pass;
    # the output side needs no transpose at all (see out layout below).
    x5 = x_pad.reshape(n, groups, cin_pg, hp, wp).transpose(0, 1, 3, 4, 2)

    # VMEM capacity (v7x: 64 MiB/TC) decides resident image vs halo-window fallback.
    try:
        cap = int(pltpu.get_tpu_info().vmem_capacity_bytes)
    except Exception:
        cap = 64 * 2 ** 20          # conservative default (v7x-sized)
    usable = int(cap * 0.8)

    x_full_bytes = hp * wp * cin_pg * itm
    windowed = bool(force_windowed) or (2 * x_full_bytes > 0.4 * usable)

    if not windowed:
        # Full padded image resident across row tiles (no halo re-DMA).
        h_blk = hp
        row_stride = th
        x_in = x5[:, :, None]                           # (N, G, 1, Hp, Wp, Cin/G)
        x_spec = pl.BlockSpec((1, 1, 1, hp, wp, cin_pg),
                              lambda b, g, t: (b, g, 0, 0, 0, 0))
    else:
        # Fallback for large images: one extra HBM pass builds overlapping
        # (TH + kh - 1)-row windows so only a small halo window is VMEM-resident.
        h_blk = th + kh - 1
        x_in = jnp.stack([x5[:, :, t * th:t * th + h_blk] for t in range(nt)],
                         axis=2)                        # (N, G, nt, TH+kh-1, Wp, Cin/G)
        row_stride = 0
        x_spec = pl.BlockSpec((1, 1, 1, h_blk, wp, cin_pg),
                              lambda b, g, t: (b, g, t, 0, 0, 0))

    w_spec = pl.BlockSpec((1, cout_pg, k_dim), lambda b, g, t: (g, 0, 0))
    o_spec = pl.BlockSpec((1, 1, cout_pg, th * wo), lambda b, g, t: (b, g, 0, t))

    # VMEM budget: double-buffered blocks + slab scratch + in-kernel temporaries.
    x_blk = h_blk * wp * cin_pg * itm
    w_blk = cout_pg * k_dim * itm
    o_blk = cout_pg * th * wo * out_itm
    slab_bytes = th * wo * k_dim * itm
    temps = th * wo * (2 * cin_pg * itm + 2 * cout_pg * 4)
    need = 2 * (x_blk + w_blk + o_blk) + slab_bytes + temps
    vmem_limit = max(min(int(need * 1.5) + (2 << 20), usable), min(32 << 20, usable))

    kernel = functools.partial(_mpconv_kernel, kh=kh, kw=kw, th=th, wo=wo,
                               row_stride=row_stride)

    out = pl.pallas_call(
        kernel,
        out_shape=jax.ShapeDtypeStruct((n, groups, cout_pg, ho * wo), out_dtype),
        grid=(n, groups, nt),
        in_specs=[x_spec, w_spec],
        out_specs=o_spec,
        scratch_shapes=[pltpu.VMEM((th * wo, k_dim), op_dtype)],
        compiler_params=pltpu.CompilerParams(
            # t is "arbitrary": megacore shards over (N, G) so both v7x cores never
            # DMA the same resident image.
            dimension_semantics=("parallel", "parallel", "arbitrary"),
            vmem_limit_bytes=vmem_limit),
    )(x_in, w2)

    # (N, G, Cout/G, Ho*Wo) -> (N, Cout, Ho, Wo): group-major channels, pure reshape.
    return out.reshape(n, out_c, ho, wo)


def _reference(x, weight, gain, groups, op_dtype):
    """Pure-JAX eval-mode reference with the given matmul operand dtype."""
    out_c, cin_pg, kh, kw = weight.shape
    fan = cin_pg * kh * kw
    w_r = weight.astype(jnp.float32) * (jnp.asarray(gain, jnp.float32) / fan ** 0.5)
    ph, pw = kh // 2, kw // 2
    if ph or pw:
        xp = jnp.pad(x, ((0, 0), (0, 0), (0, ph), (pw, pw)), mode="reflect")
    else:
        xp = x
    y = lax.conv_general_dilated(
        xp.astype(op_dtype), w_r.astype(op_dtype),
        window_strides=(1, 1), padding="VALID",
        dimension_numbers=("NCHW", "OIHW", "NCHW"),
        feature_group_count=groups,
        preferred_element_type=jnp.float32)
    return y.astype(x.dtype)


def _run_and_check(key, *, n, c_in, hgt, wid, c_out, kh, kw, groups, gain,
                   row_tile=None, force_windowed=False):
    k_x, k_w = jax.random.split(key)
    x = jax.random.normal(k_x, (n, c_in, hgt, wid), dtype=jnp.float32)
    weight = jax.random.normal(k_w, (c_out, c_in // groups, kh, kw), dtype=jnp.float32)

    out = mpconv1d_forward(x, weight, gain=gain, groups=groups,
                           row_tile=row_tile, force_windowed=force_windowed)
    out = jax.block_until_ready(out)

    ref_hi = _reference(x, weight, gain, groups, jnp.float32)     # module semantics
    ref_lo = _reference(x, weight, gain, groups, jnp.bfloat16)    # matched MXU dtype
    assert out.shape == ref_hi.shape, (out.shape, ref_hi.shape)

    err_lo = float(jnp.max(jnp.abs(out - ref_lo)))
    assert jnp.allclose(out, ref_lo, atol=1e-3, rtol=1e-3), err_lo
    err_hi = float(jnp.max(jnp.abs(out - ref_hi)))
    assert jnp.allclose(out, ref_hi, atol=2e-2, rtol=2e-2), err_hi
    return out


if __name__ == "__main__":
    key = jax.random.PRNGKey(0)
    k0, k1, k2, k3 = jax.random.split(key, 4)

    # A: plain conv, groups=1; single resident row tile.
    _run_and_check(k0, n=2, c_in=8, hgt=16, wid=16, c_out=8, kh=2, kw=3,
                   groups=1, gain=1.0)

    # B: grouped conv + non-unit gain; two resident row tiles (exercises r0 = t*TH).
    _run_and_check(k1, n=2, c_in=8, hgt=16, wid=16, c_out=8, kh=2, kw=3,
                   groups=2, gain=1.3, row_tile=8)

    # C: forced windowed (non-resident) fallback path with two halo windows.
    _run_and_check(k2, n=2, c_in=8, hgt=16, wid=16, c_out=8, kh=2, kw=3,
                   groups=1, gain=1.0, row_tile=8, force_windowed=True)

    # D: 1x1 kernel -> ReflectionPad degenerates to Identity (module's no-pad branch).
    _run_and_check(k3, n=2, c_in=8, hgt=16, wid=16, c_out=16, kh=1, kw=1,
                   groups=1, gain=1.0)

    print("KERNEL_OK")
</pallas_src>

<mosaic_0001>
module attributes {stable_mosaic.version = 11 : i64} {
  func.func @_mpconv_kernel(%arg0: i32, %arg1: i32, %arg2: i32, %arg3: memref<1x1x1x17x18x8xbf16, #tpu.memory_space<vmem>>, %arg4: memref<1x8x48xbf16, #tpu.memory_space<vmem>>, %arg5: memref<1x1x8x256xf32, #tpu.memory_space<vmem>>, %arg6: memref<256x48xbf16, #tpu.memory_space<vmem>>) attributes {dimension_semantics = [#tpu.dimension_semantics<parallel>, #tpu.dimension_semantics<parallel>, #tpu.dimension_semantics<arbitrary>], iteration_bounds = array<i64: 2, 1, 1>, scalar_prefetch = 0 : i64, scratch_operands = 1 : i64, tpu.core_type = #tpu.core_type<tc>, window_params = [{transform_indices = @transform_0, window_bounds = array<i64: 1, 1, 1, 17, 18, 8>}, {transform_indices = @transform_1, window_bounds = array<i64: 1, 8, 48>}, {transform_indices = @transform_2, window_bounds = array<i64: 1, 1, 8, 256>}]} {
    %c16_i32 = arith.constant 16 : i32
    %0 = arith.muli %arg2, %c16_i32 : i32
    %1 = tpu.assume_multiple %0, 8 : i32
    %c0_i32 = arith.constant 0 : i32
    %2 = arith.addi %1, %c0_i32 : i32
    %c0 = arith.constant 0 : index
    %c0_0 = arith.constant 0 : index
    %c0_1 = arith.constant 0 : index
    %3 = arith.index_cast %2 : i32 to index
    %c0_2 = arith.constant 0 : index
    %c0_3 = arith.constant 0 : index
    %4 = vector.load %arg3[%c0, %c0_0, %c0_1, %3, %c0_2, %c0_3] : memref<1x1x1x17x18x8xbf16, #tpu.memory_space<vmem>>, vector<1x1x1x16x16x8xbf16>
    %5 = vector.shape_cast %4 : vector<1x1x1x16x16x8xbf16> to vector<16x16x8xbf16>
    %6 = vector.shape_cast %5 : vector<16x16x8xbf16> to vector<256x8xbf16>
    %c0_4 = arith.constant 0 : index
    %c0_5 = arith.constant 0 : index
    %7 = vector.load %arg6[%c0_4, %c0_5] : memref<256x48xbf16, #tpu.memory_space<vmem>>, vector<256x8xbf16>
    tpu.vector_store %arg6[%c0_4, %c0_5], %6 {strides = array<i32>} : memref<256x48xbf16, #tpu.memory_space<vmem>>, vector<256x8xbf16>,
    %c0_i32_6 = arith.constant 0 : i32
    %8 = arith.addi %1, %c0_i32_6 : i32
    %c0_7 = arith.constant 0 : index
    %c0_8 = arith.constant 0 : index
    %c0_9 = arith.constant 0 : index
    %9 = arith.index_cast %8 : i32 to index
    %c1 = arith.constant 1 : index
    %c0_10 = arith.constant 0 : index
    %10 = vector.load %arg3[%c0_7, %c0_8, %c0_9, %9, %c1, %c0_10] : memref<1x1x1x17x18x8xbf16, #tpu.memory_space<vmem>>, vector<1x1x1x16x16x8xbf16>
    %11 = vector.shape_cast %10 : vector<1x1x1x16x16x8xbf16> to vector<16x16x8xbf16>
    %12 = vector.shape_cast %11 : vector<16x16x8xbf16> to vector<256x8xbf16>
    %c0_11 = arith.constant 0 : index
    %c8 = arith.constant 8 : index
    %13 = vector.load %arg6[%c0_11, %c8] : memref<256x48xbf16, #tpu.memory_space<vmem>>, vector<256x8xbf16>
    tpu.vector_store %arg6[%c0_11, %c8], %12 {strides = array<i32>} : memref<256x48xbf16, #tpu.memory_space<vmem>>, vector<256x8xbf16>,
    %c0_i32_12 = arith.constant 0 : i32
    %14 = arith.addi %1, %c0_i32_12 : i32
    %c0_13 = arith.constant 0 : index
    %c0_14 = arith.constant 0 : index
    %c0_15 = arith.constant 0 : index
    %15 = arith.index_cast %14 : i32 to index
    %c2 = arith.constant 2 : index
    %c0_16 = arith.constant 0 : index
    %16 = vector.load %arg3[%c0_13, %c0_14, %c0_15, %15, %c2, %c0_16] : memref<1x1x1x17x18x8xbf16, #tpu.memory_space<vmem>>, vector<1x1x1x16x16x8xbf16>
    %17 = vector.shape_cast %16 : vector<1x1x1x16x16x8xbf16> to vector<16x16x8xbf16>
    %18 = vector.shape_cast %17 : vector<16x16x8xbf16> to vector<256x8xbf16>
    %c0_17 = arith.constant 0 : index
    %c16 = arith.constant 16 : index
    %19 = vector.load %arg6[%c0_17, %c16] : memref<256x48xbf16, #tpu.memory_space<vmem>>, vector<256x8xbf16>
    tpu.vector_store %arg6[%c0_17, %c16], %18 {strides = array<i32>} : memref<256x48xbf16, #tpu.memory_space<vmem>>, vector<256x8xbf16>,
    %c1_i32 = arith.constant 1 : i32
    %20 = arith.addi %1, %c1_i32 : i32
    %c0_18 = arith.constant 0 : index
    %c0_19 = arith.constant 0 : index
    %c0_20 = arith.constant 0 : index
    %21 = arith.index_cast %20 : i32 to index
    %c0_21 = arith.constant 0 : index
    %c0_22 = arith.constant 0 : index
    %22 = vector.load %arg3[%c0_18, %c0_19, %c0_20, %21, %c0_21, %c0_22] : memref<1x1x1x17x18x8xbf16, #tpu.memory_space<vmem>>, vector<1x1x1x16x16x8xbf16>
    %23 = vector.shape_cast %22 : vector<1x1x1x16x16x8xbf16> to vector<16x16x8xbf16>
    %24 = vector.shape_cast %23 : vector<16x16x8xbf16> to vector<256x8xbf16>
    %c0_23 = arith.constant 0 : index
    %c24 = arith.constant 24 : index
    %25 = vector.load %arg6[%c0_23, %c24] : memref<256x48xbf16, #tpu.memory_space<vmem>>, vector<256x8xbf16>
    tpu.vector_store %arg6[%c0_23, %c24], %24 {strides = array<i32>} : memref<256x48xbf16, #tpu.memory_space<vmem>>, vector<256x8xbf16>,
    %c1_i32_24 = arith.constant 1 : i32
    %26 = arith.addi %1, %c1_i32_24 : i32
    %c0_25 = arith.constant 0 : index
    %c0_26 = arith.constant 0 : index
    %c0_27 = arith.constant 0 : index
    %27 = arith.index_cast %26 : i32 to index
    %c1_28 = arith.constant 1 : index
    %c0_29 = arith.constant 0 : index
    %28 = vector.load %arg3[%c0_25, %c0_26, %c0_27, %27, %c1_28, %c0_29] : memref<1x1x1x17x18x8xbf16, #tpu.memory_space<vmem>>, vector<1x1x1x16x16x8xbf16>
    %29 = vector.shape_cast %28 : vector<1x1x1x16x16x8xbf16> to vector<16x16x8xbf16>
    %30 = vector.shape_cast %29 : vector<16x16x8xbf16> to vector<256x8xbf16>
    %c0_30 = arith.constant 0 : index
    %c32 = arith.constant 32 : index
    %31 = vector.load %arg6[%c0_30, %c32] : memref<256x48xbf16, #tpu.memory_space<vmem>>, vector<256x8xbf16>
    tpu.vector_store %arg6[%c0_30, %c32], %30 {strides = array<i32>} : memref<256x48xbf16, #tpu.memory_space<vmem>>, vector<256x8xbf16>,
    %c1_i32_31 = arith.constant 1 : i32
    %32 = arith.addi %1, %c1_i32_31 : i32
    %c0_32 = arith.constant 0 : index
    %c0_33 = arith.constant 0 : index
    %c0_34 = arith.constant 0 : index
    %33 = arith.index_cast %32 : i32 to index
    %c2_35 = arith.constant 2 : index
    %c0_36 = arith.constant 0 : index
    %34 = vector.load %arg3[%c0_32, %c0_33, %c0_34, %33, %c2_35, %c0_36] : memref<1x1x1x17x18x8xbf16, #tpu.memory_space<vmem>>, vector<1x1x1x16x16x8xbf16>
    %35 = vector.shape_cast %34 : vector<1x1x1x16x16x8xbf16> to vector<16x16x8xbf16>
    %36 = vector.shape_cast %35 : vector<16x16x8xbf16> to vector<256x8xbf16>
    %c0_37 = arith.constant 0 : index
    %c40 = arith.constant 40 : index
    %37 = vector.load %arg6[%c0_37, %c40] : memref<256x48xbf16, #tpu.memory_space<vmem>>, vector<256x8xbf16>
    tpu.vector_store %arg6[%c0_37, %c40], %36 {strides = array<i32>} : memref<256x48xbf16, #tpu.memory_space<vmem>>, vector<256x8xbf16>,
    %c0_38 = arith.constant 0 : index
    %c0_39 = arith.constant 0 : index
    %c0_40 = arith.constant 0 : index
    %38 = vector.load %arg4[%c0_38, %c0_39, %c0_40] : memref<1x8x48xbf16, #tpu.memory_space<vmem>>, vector<1x8x48xbf16>
    %39 = vector.shape_cast %38 : vector<1x8x48xbf16> to vector<8x48xbf16>
    %c0_41 = arith.constant 0 : index
    %c0_42 = arith.constant 0 : index
    %40 = vector.load %arg6[%c0_41, %c0_42] : memref<256x48xbf16, #tpu.memory_space<vmem>>, vector<256x48xbf16>
    %cst = arith.constant dense<0.000000e+00> : vector<8x256xf32>
    %41 = tpu.matmul %39, %40, %cst {dimension_numbers = #tpu.dot_dimension_numbers<[1], [1], [0], [0], [0, 0, 1, 0], [], []>} : vector<8x48xbf16>, vector<256x48xbf16>, vector<8x256xf32> -> vector<8x256xf32>
    %c0_43 = arith.constant 0 : index
    %c0_44 = arith.constant 0 : index
    %c0_45 = arith.constant 0 : index
    %c0_46 = arith.constant 0 : index
    %42 = vector.load %arg5[%c0_43, %c0_44, %c0_45, %c0_46] : memref<1x1x8x256xf32, #tpu.memory_space<vmem>>, vector<1x1x8x256xf32>
    %43 = vector.shape_cast %42 : vector<1x1x8x256xf32> to vector<8x256xf32>
    %44 = vector.shape_cast %41 : vector<8x256xf32> to vector<1x1x8x256xf32>
    tpu.vector_store %arg5[%c0_43, %c0_44, %c0_45, %c0_46], %44 {strides = array<i32>} : memref<1x1x8x256xf32, #tpu.memory_space<vmem>>, vector<1x1x8x256xf32>,
    return
  }
  func.func @transform_0(%arg0: i32, %arg1: i32, %arg2: i32) -> (i32, i32, i32, i32, i32, i32) {
    %c0_i32 = arith.constant 0 : i32
    %c0_i32_0 = arith.constant 0 : i32
    %c0_i32_1 = arith.constant 0 : i32
    %c0_i32_2 = arith.constant 0 : i32
    %c0_i32_3 = arith.constant 0 : i32
    return %arg0, %arg1, %c0_i32, %c0_i32_0, %c0_i32_1, %c0_i32_2 : i32, i32, i32, i32, i32, i32
  }
  func.func @transform_1(%arg0: i32, %arg1: i32, %arg2: i32) -> (i32, i32, i32) {
    %c0_i32 = arith.constant 0 : i32
    %c0_i32_0 = arith.constant 0 : i32
    %c0_i32_1 = arith.constant 0 : i32
    return %arg1, %c0_i32, %c0_i32_0 : i32, i32, i32
  }
  func.func @transform_2(%arg0: i32, %arg1: i32, %arg2: i32) -> (i32, i32, i32, i32) {
    %c0_i32 = arith.constant 0 : i32
    %c0_i32_0 = arith.constant 0 : i32
    return %arg0, %arg1, %c0_i32, %arg2 : i32, i32, i32, i32
  }
}

</mosaic_0001>

<bundles_post_ra>
// kernel: tpu_custom_call.1
= control target key start
LH: loop header
LB: loop body
LE: loop exit
PB: predicated region body
PF: predicated region fallthrough
CT: control target
= control target key end

     0   :  { %7 = vsyncpa [#allocation4], 0  ;;  %s4106_s0 = inlined_call_operand.vmem [shape: bf16[2,1,1,17,18,8], index: 0, kind: input, shape index: {}]   ;;  %s4107_s1 = inlined_call_operand.vmem [shape: bf16[1,8,48], index: 1, kind: input, shape index: {}]   ;;  %s4108_s2 = inlined_call_operand.hbm [shape: f32[2,1,8,256], index: 2, kind: output, shape index: {}]  }
   0x1   :  { %9 = vsyncpa [#allocation4 + $0x1], 0  ;;  %s2991_s9 = smov 0   ;;  %s2993_s10 = smov 0  }
   0x2   :  { %s2995_s11 = smov 0   ;;  %s2997_s12 = smov 0  }
   0x3   :  { %s2999_s13 = smov 0   ;;  %s3001_s14 = smov 0  }
   0x4 LB: > { %s2598_s15 = sadd.s32 4294967295, %s2968_s14   ;;  %s2599_s16 = sadd.s32 4294967294, %s2968_s14   ;;  %s2968_s14 = sphi %s3001_s14, %s15_s14   ;;  %s2964_s13 = sphi %s2999_s13, %s4119_s13   ;;  %s2960_s12 = sphi %s2997_s12, %s4118_s12   ;;  %s2956_s11 = sphi %s2995_s11, %s4117_s11   ;;  %s2952_s10 = sphi %s2993_s10, %s4116_s10   ;;  %s2948_s9 = sphi %s2991_s9, %s4115_s9  }
   0x5   : > { %s34_s17 = sadd.s32 1, %s2964_s13  ;;  %s99_s18 = sadd.s32 1, %s2956_s11 }
   0x6   : > { %p36_p0 = scmp.ge.s32.totalorder %s34_s17, 2  ;;  %p109_p1 = scmp.ne.s32.totalorder %s2956_s11, %s2952_s10 }
   0x7   : > { %p110_p2 = scmp.eq.s32.totalorder %s2598_s15, 1  ;;  %p115_p3 = scmp.ne.s32.totalorder %s2952_s10, %s2948_s9 }
   0x8   : > { %s4121_s17 = smov (%p36_p0, %s34_s17), 0  ;;  %p116_p5 = scmp.eq.s32.totalorder %s2599_s16, 1 }
   0x9   : > { %p3031_p4 = por %p110_p2, %p109_p1  ;;  %s92_s20 = ssub.s32 %s2964_s13, %s4121_s17 }
   0xa   : > { %p2603_p6 = scmp.ge.s32.totalorder %s2968_s14, 1  ;;  %p97_p7 = scmp.eq.s32.totalorder %s92_s20, 0 }
   0xb   : > { %p3038_p8 = por %p116_p5, %p115_p3  ;;  %p153_p9 = scmp.lt.s32.totalorder %s2968_s14, 3 }
   0xc   : > { %s3044_s22 = scalar_select %p97_p7, %s2956_s11, %s99_s18  }
   0xd   : > { %p154_p10 = pnand %p2603_p6, %p153_p9 }
   0xe   : > { %p183_p11 = scmp.lt.s32.totalorder (!%p154_p10), %s2960_s12, 1  ;;  %s2970_s28 = smov (!%p154_p10), 24  }
   0xf   : > { %157 = sbr.rel (%p154_p10) target bundleno = 685 (0x2ad), region = 28  ;;  %s2971_s29 = smov (!%p154_p10), 16  }
  0x10   : > { %s2972_s30 = smov (!%p154_p10), 8   ;;  %s2973_s3 = smov (!%p154_p10), 32  }
  0x11   : > { %s2974_s4 = smov (!%p154_p10), 40   ;;  %s180_s7 = sand.u32 (!%p154_p10), 1, %s2952_s10  }
  0x12   : > { %s2604_s8 = sshll.u32 (!%p154_p10), %s180_s7, 4  ;;  %s2788_s18 = sshll.u32 (!%p154_p10), %s2960_s12, 8 }
  0x13   : > { %s182_s15 = scalar_lea.vmem (!%p154_p10), [#allocation3], %s2604_s8  ;;  %s2475_s25 = scalar_lea.sflag (!%p154_p10), [#allocation4], %s180_s7 }
  0x14   : > { %s184_s23 = scalar_select %p183_p11, %s2960_s12, 1  ;;  %vm927_vm0 = vcmask 1042432   ;;  %vm928_vm1 = vcmask 1046532   ;;  %vm315_vm3 = vsmask.f32 3328  ;;  %vm234_vm6 = vcmask 60416  }
  0x15   : > { %vm3053_vm2 = vmor %vm927_vm0, %vm928_vm1  ;;  %vm316_vm4 = vsmask.f32 7440  ;;  %vm798_vm7 = vcmask 126016   ;;  %vm1138_vm8 = vcmask 191616   ;;  %vm1335_vm9 = vcmask 257216   ;;  %s2493_s16 = sshll.u32 %s182_s15, 4  ;;  %s4057_s16 = int_to_ptr.vmem [resolvable:$true] %s2493_s16 }
  0x16   : > { %s2815_s24 = smul.u32 204, %s184_s23  ;;  %vm3087_vm5 = vmor %vm315_vm3, %vm316_vm4  ;;  %vm1896_vm10 = vcmask 322816   ;;  %vm2233_vm11 = vcmask 388416   ;;  %vm2379_vm12 = vcmask 392192   ;;  %s2892_s26 = scalar_lea.vmem %s4057_s16, 256 }
  0x17   : > { %p2893_p12 = scmp.ne.s32.totalorder %s4057_s16, %s2892_s26  ;;  %s2975_s12 = smov [#allocation3]  }
  0x18   : > { %s3051_s27 = scalar_lea.vmem %s4106_s0, %s2815_s24  ;;  %s4062_s24 = scalar_lea.hbm %s4108_s2, %s2788_s18 }
  0x19   : > { %v2637_v1 = vld [vmem:[%s3051_s27 + $0x64] sm:$0xf]  ;;  %v852_v2 = vld [vmem:[%s3051_s27 + $0x54] sm:$0xe]  ;;  %v853_v3 = vld [vmem:[%s3051_s27 + $0x58] sm:$0xf]  ;;  %p2894_p13 = pnand %p2893_p12, %p3031_p4 }
  0x1a   : > { %1269 = vrot.lane.b32.xlu1 %v2637_v1, %s2970_s28  ;;  %v2613_v4 = vrot.slane %v852_v2, 9  ;;  %v981_v5 = vrot.slane %v853_v3, 5  ;;  %v854_v6 = vld [vmem:[%s3051_s27 + $0x5c] sm:$0x1]  ;;  %v876_v7 = vld [vmem:[%s3051_s27 + $0xb4] sm:$0xe] }
  0x1b   : > { %v984_v8 = vrot.slane %v854_v6, 5  ;;  %v877_v9 = vld [vmem:[%s3051_s27 + $0xb8] sm:$0xf]  ;;  %v2621_v10 = vrot.slane %v876_v7, 9  ;;  %v878_v11 = vld [vmem:[%s3051_s27 + $0xbc] sm:$0x1]  ;;  %p2895_p0 = pneg %p2894_p13 }
  0x1c   : > { %v982_v12 = vsel %vm3053_vm2, %v2613_v4, %v981_v5  ;;  %v983_v13 = vrot.slane %v981_v5, 4  ;;  %v1037_v14 = vrot.slane %v877_v9, 5  ;;  %v1040_v15 = vrot.slane %v878_v11, 5  ;;  %v312_v16 = vld [vmem:[%s3051_s27 + $0xb4] sm:$0xf] }
  0x1d   : > { %1070 = vrot.lane.b32.xlu0 %v982_v12, %s2971_s29  ;;  %v313_v17 = vld [vmem:[%s3051_s27 + $0xb8] sm:$0xf]  ;;  %v288_v18 = vld [vmem:[%s3051_s27 + $0x54] sm:$0xf]  ;;  %v679_v22 = vshrl.u32 %v312_v16, 16  ;;  %v682_v24 = vshll.u32 %v312_v16, 16 }
  0x1e   : > { %v985_v19 = vsel %vm3053_vm2, %v983_v13, %v984_v8  ;;  %v1038_v20 = vsel %vm3053_vm2, %v2621_v10, %v1037_v14  ;;  %v1039_v21 = vrot.slane %v1037_v14, 4  ;;  %v289_v23 = vld [vmem:[%s3051_s27 + $0x58] sm:$0xf]  ;;  %v688_v25 = vshll.u32 %v313_v17, 16  ;;  %v314_v28 = vld [vmem:[%s3051_s27 + $0xbc] sm:$0x1] }
  0x1f   : > { %1072 = vrot.lane.b32.xlu1 %v985_v19, %s2971_s29  ;;  %v692_v26 = vshrl.u32 %v313_v17, 16  ;;  %v487_v27 = vshrl.u32 %v288_v18, 16  ;;  %v681_v30 = vrot.slane %v679_v22, 4  ;;  %v490_v31 = vshll.u32 %v288_v18, 16  ;;  %v290_v33 = vld [vmem:[%s3051_s27 + $0x5c] sm:$0x1] }
  0x20   : > { %v1041_v29 = vsel %vm3053_vm2, %v1039_v21, %v1040_v15  ;;  %v496_v32 = vshll.u32 %v289_v23, 16  ;;  %v2636_v34 = vld [vmem:[%s3051_s27 + $0x60] sm:$0xf]  ;;  %v684_v35 = vrot.slane %v682_v24, 5  ;;  %v690_v36 = vrot.slane %v688_v25, 5 }
  0x21   : > { %1102 = vrot.lane.b32.xlu0 %v1038_v20, %s2971_s29  ;;  %v489_v37 = vrot.slane %v487_v27, 4  ;;  %v500_v38 = vshrl.u32 %v289_v23, 16  ;;  %v492_v39 = vrot.slane %v490_v31, 5  ;;  %v694_v41 = vrot.slane %v692_v26, 4  ;;  %v2676_v43 = vld [vmem:[%s3051_s27 + $0x64] sm:$0xf] }
  0x22   : > { %v498_v40 = vrot.slane %v496_v32, 5  ;;  %v698_v42 = vshll.u32 %v314_v28, 16  ;;  %v685_v44 = vor.u32 %v684_v35, %v681_v30  ;;  %v506_v46 = vshll.u32 %v290_v33, 16  ;;  %v2675_v53 = vld [vmem:[%s3051_s27 + $0x60] sm:$0xf] }
  0x23   : > { %1104 = vrot.lane.b32.xlu1 %v1041_v29, %s2971_s29  ;;  %v502_v45 = vrot.slane %v500_v38, 4  ;;  %v1594_v47 = vshll.u32 %v2676_v43, 16  ;;  %v493_v49 = vor.u32 %v492_v39, %v489_v37  ;;  %v695_v50 = vor.u32 %v694_v41, %v690_v36  ;;  %v2677_v56 = vld [vmem:[%s3051_s27 + $0x68] sm:$0x1]  ;;  %v2700_v62 = vld [vmem:[%s3051_s27 + $0xc4] sm:$0xf] }
  0x24   : > { %v700_v51 = vrot.slane %v698_v42, 5  ;;  %v1598_v52 = vshrl.u32 %v2676_v43, 16  ;;  %v686_v54 = vrot.slane %v685_v44, 4  ;;  %v508_v60 = vrot.slane %v506_v46, 5  ;;  %v2699_v4 = vld [vmem:[%s3051_s27 + $0xc0] sm:$0xf] }
  0x25   : > { %1267 = vrot.lane.b32.xlu0 %v2636_v34, %s2970_s28  ;;  %v503_v55 = vor.u32 %v502_v45, %v498_v40  ;;  %v3094_v57 = vrot.slane %v1594_v47, 5  ;;  %v494_v58 = vrot.slane %v493_v49, 4  ;;  %v696_v59 = vrot.slane %v695_v50, 4  ;;  %v2701_v11 = vld [vmem:[%s3051_s27 + $0xc8] sm:$0x1] }
  0x26   : > { %v1600_v61 = vrot.slane %v1598_v52, 4  ;;  %v691_v63 = vsel %vm3087_vm5, %v686_v54, %v690_v36  ;;  %v1585_v2 = vshrl.u32 %v2675_v53, 16  ;;  %v1588_v3 = vshll.u32 %v2675_v53, 16  ;;  %v2653_v16 = vld [vmem:[%s3051_s27 + $0xc4] sm:$0xf] }
  0x27   : > { %v504_v1 = vrot.slane %v503_v55, 4  ;;  %762 = vrot.lane.b32.xlu1 %v691_v63, %s2972_s30  ;;  %v499_v5 = vsel %vm3087_vm5, %v494_v58, %v498_v40  ;;  %v701_v6 = vsel %vm3087_vm5, %v696_v59, %v700_v51  ;;  %v1604_v7 = vshll.u32 %v2677_v56, 16  ;;  %v2724_v23 = vld [vmem:[%s3051_s27 + $0x64] sm:$0xf]  ;;  %v286_v27 = vld [vmem:[%s3051_s27 + $0x4c] sm:$0xf] }
  0x28   : > { %v1601_v8 = vor.u32 %v1600_v61, %v3094_v57  ;;  %v1587_v9 = vrot.slane %v1585_v2, 4  ;;  %v1590_v10 = vrot.slane %v1588_v3, 5  ;;  %v1786_v12 = vshll.u32 %v2700_v62, 16  ;;  %v2652_v28 = vld [vmem:[%s3051_s27 + $0xc0] sm:$0xf] }
  0x29   : > { %730 = vrot.lane.b32.xlu0 %v499_v5, %s2972_s30  ;;  %v509_v13 = vsel %vm3087_vm5, %v504_v1, %v508_v60  ;;  %v1790_v14 = vshrl.u32 %v2700_v62, 16  ;;  %v1777_v15 = vshrl.u32 %v2699_v4, 16  ;;  %v1780_v19 = vshll.u32 %v2699_v4, 16  ;;  %v285_v33 = vld [vmem:[%s3051_s27 + $0x48] sm:$0xf] }
  0x2a   : > { %v1591_v17 = vor.u32 %v1590_v10, %v1587_v9  ;;  %v1788_v18 = vrot.slane %v1786_v12, 5  ;;  %v1796_v21 = vshll.u32 %v2701_v11, 16  ;;  %v1602_v24 = vrot.slane %v1601_v8, 4  ;;  %v2725_v36 = vld [vmem:[%s3051_s27 + $0x68] sm:$0x1] }
  0x2b   : > { %764 = vrot.lane.b32.xlu1 %v701_v6, %s2972_s30  ;;  %v1792_v20 = vrot.slane %v1790_v14, 4  ;;  %v1779_v22 = vrot.slane %v1777_v15, 4  ;;  %v1606_v25 = vrot.slane %v1604_v7, 5  ;;  %v1782_v26 = vrot.slane %v1780_v19, 5  ;;  %v2723_v40 = vld [vmem:[%s3051_s27 + $0x60] sm:$0xe] }
  0x2c   : > { %v1592_v29 = vrot.slane %v1591_v17, 4  ;;  %v2076_v32 = vrot.slane %v2724_v23, 5  ;;  %v1798_v35 = vrot.slane %v1796_v21, 5  ;;  %v472_v37 = vshll.u32 %v286_v27, 16  ;;  %v2748_v41 = vld [vmem:[%s3051_s27 + $0xc4] sm:$0xf] }
  0x2d   : > { %732 = vrot.lane.b32.xlu0 %v509_v13, %s2972_s30  ;;  %v1793_v30 = vor.u32 %v1792_v20, %v1788_v18  ;;  %v1783_v31 = vor.u32 %v1782_v26, %v1779_v22  ;;  %v1607_v38 = vsel %vm3087_vm5, %v1602_v24, %v1606_v25  ;;  %v476_v42 = vshrl.u32 %v286_v27, 16  ;;  %v310_v45 = vld [vmem:[%s3051_s27 + $0xac] sm:$0xf]  ;;  %v309_v50 = vld [vmem:[%s3051_s27 + $0xa8] sm:$0xf] }
  0x2e   : > { %v1597_v43 = vsel %vm3087_vm5, %v1592_v29, %v3094_v57  ;;  %v463_v44 = vshrl.u32 %v285_v33, 16  ;;  %v2078_v46 = vrot.slane %v2076_v32, 4  ;;  %v2079_v47 = vrot.slane %v2725_v36, 5  ;;  %v2749_v53 = vld [vmem:[%s3051_s27 + $0xc8] sm:$0x1] }
  0x2f   : > { %1301 = vrot.lane.b32.xlu1 %v2653_v16, %s2970_s28  ;;  %v1794_v34 = vrot.slane %v1793_v30, 4  ;;  %v1784_v39 = vrot.slane %v1783_v31, 4  ;;  %v466_v49 = vshll.u32 %v285_v33, 16  ;;  %v2757_v52 = vrot.slane %v2723_v40, 9  ;;  %v2747_v57 = vld [vmem:[%s3051_s27 + $0xc0] sm:$0xe] }
  0x30   : > { %v2132_v54 = vrot.slane %v2748_v41, 5  ;;  %v474_v55 = vrot.slane %v472_v37, 5  ;;  %v478_v58 = vrot.slane %v476_v42, 4  ;;  %v664_v59 = vshll.u32 %v310_v45, 16  ;;  %v287_v61 = vld [vmem:[%s3051_s27 + $0x50] sm:$0x1] }
  0x31   : > { %1299 = vrot.lane.b32.xlu0 %v2652_v28, %s2970_s28  ;;  %v1799_v51 = vsel %vm3087_vm5, %v1794_v34, %v1798_v35  ;;  %v1789_v56 = vsel %vm3087_vm5, %v1784_v39, %v1788_v18  ;;  %v668_v60 = vshrl.u32 %v310_v45, 16  ;;  %v465_v62 = vrot.slane %v463_v44, 4  ;;  %v311_v13 = vld [vmem:[%s3051_s27 + $0xb0] sm:$0x1]  ;;  %v850_v21 = vld [vmem:[%s3051_s27 + $0x4c] sm:$0xf] }
  0x32   : > { %v468_v63 = vrot.slane %v466_v49, 5  ;;  %v655_v1 = vshrl.u32 %v309_v50, 16  ;;  %v658_v2 = vshll.u32 %v309_v50, 16  ;;  %v2080_v3 = vsel %vm3053_vm2, %v2078_v46, %v2079_v47  ;;  %v851_v29 = vld [vmem:[%s3051_s27 + $0x50] sm:$0x1] }
  0x33   : > { %1830 = vrot.lane.b32.xlu1 %v1607_v38, %s2973_s3  ;;  %v2134_v4 = vrot.slane %v2132_v54, 4  ;;  %v2135_v5 = vrot.slane %v2749_v53, 5  ;;  %v2765_v6 = vrot.slane %v2747_v57, 9  ;;  %v479_v7 = vor.u32 %v478_v58, %v474_v55  ;;  %v849_v33 = vld [vmem:[%s3051_s27 + $0x48] sm:$0xe] }
  0x34   : > { %v482_v8 = vshll.u32 %v287_v61, 16  ;;  %v666_v9 = vrot.slane %v664_v59, 5  ;;  %v670_v10 = vrot.slane %v668_v60, 4  ;;  %v2077_v11 = vsel %vm3053_vm2, %v2757_v52, %v2076_v32  ;;  %v874_v32 = vld [vmem:[%s3051_s27 + $0xac] sm:$0xf] }
  0x35   : > { %1828 = vrot.lane.b32.xlu0 %v1597_v43, %s2973_s3  ;;  %v469_v12 = vor.u32 %v468_v63, %v465_v62  ;;  %v657_v14 = vrot.slane %v655_v1, 4  ;;  %v660_v15 = vrot.slane %v658_v2, 5  ;;  %v2136_v16 = vsel %vm3053_vm2, %v2134_v4, %v2135_v5  ;;  %v875_v37 = vld [vmem:[%s3051_s27 + $0xb0] sm:$0x1]  ;;  %v873_v41 = vld [vmem:[%s3051_s27 + $0xa8] sm:$0xe] }
  0x36   : > { %v480_v17 = vrot.slane %v479_v7, 4  ;;  %v484_v18 = vrot.slane %v482_v8, 5  ;;  %v671_v19 = vor.u32 %v670_v10, %v666_v9  ;;  %v674_v20 = vshll.u32 %v311_v13, 16  ;;  %v2673_v42 = vld [vmem:[%s3051_s27 + $0x58] sm:$0xf] }
  0x37   : > { %1862 = vrot.lane.b32.xlu1 %v1799_v51, %s2973_s3  ;;  %v2133_v22 = vsel %vm3053_vm2, %v2765_v6, %v2132_v54  ;;  %v470_v23 = vrot.slane %v469_v12, 4  ;;  %v661_v24 = vor.u32 %v660_v15, %v657_v14  ;;  %v974_v25 = vrot.slane %v850_v21, 5  ;;  %v2672_v43 = vld [vmem:[%s3051_s27 + $0x54] sm:$0xf]  ;;  %v2697_v51 = vld [vmem:[%s3051_s27 + $0xb8] sm:$0xf] }
  0x38   : > { %v485_v26 = vsel %vm3087_vm5, %v480_v17, %v484_v18  ;;  %v672_v27 = vrot.slane %v671_v19, 4  ;;  %v676_v28 = vrot.slane %v674_v20, 5  ;;  %v977_v35 = vrot.slane %v851_v29, 5  ;;  %v2674_v62 = vld [vmem:[%s3051_s27 + $0x5c] sm:$0x1] }
  0x39   : > { %1860 = vrot.lane.b32.xlu0 %v1789_v56, %s2973_s3  ;;  %v475_v30 = vsel %vm3087_vm5, %v470_v23, %v474_v55  ;;  %v662_v31 = vrot.slane %v661_v24, 4  ;;  %v976_v34 = vrot.slane %v974_v25, 4  ;;  %v1030_v38 = vrot.slane %v874_v32, 5  ;;  %v2696_v55 = vld [vmem:[%s3051_s27 + $0xb4] sm:$0xf] }
  0x3a   : > { %v677_v36 = vsel %vm3087_vm5, %v672_v27, %v676_v28  ;;  %v2612_v40 = vrot.slane %v849_v33, 9  ;;  %v1033_v45 = vrot.slane %v875_v37, 5  ;;  %v2620_v47 = vrot.slane %v873_v41, 9  ;;  %v2635_v6 = vld [vmem:[%s3051_s27 + $0x58] sm:$0xf] }
  0x3b   : > { %2167 = vrot.lane.b32.xlu1 %v2080_v3, %s2974_s4  ;;  %v667_v39 = vsel %vm3087_vm5, %v662_v31, %v666_v9  ;;  %v978_v44 = vsel %vm3053_vm2, %v976_v34, %v977_v35  ;;  %v1032_v46 = vrot.slane %v1030_v38, 4  ;;  %v1570_v49 = vshll.u32 %v2673_v42, 16  ;;  %v2698_v9 = vld [vmem:[%s3051_s27 + $0xbc] sm:$0x1]  ;;  %v2634_v10 = vld [vmem:[%s3051_s27 + $0x54] sm:$0xf] }
  0x3c   : > { %v1574_v50 = vshrl.u32 %v2673_v42, 16  ;;  %v975_v52 = vsel %vm3053_vm2, %v2612_v40, %v974_v25  ;;  %v1561_v53 = vshrl.u32 %v2672_v43, 16  ;;  %v1564_v54 = vshll.u32 %v2672_v43, 16  ;;  %v2721_v14 = vld [vmem:[%s3051_s27 + $0x58] sm:$0xf] }
  0x3d   : > { %2165 = vrot.lane.b32.xlu0 %v2077_v11, %s2974_s4  ;;  %v1762_v56 = vshll.u32 %v2697_v51, 16  ;;  %v1766_v57 = vshrl.u32 %v2697_v51, 16  ;;  %v1034_v58 = vsel %vm3053_vm2, %v1032_v46, %v1033_v45  ;;  %v1031_v59 = vsel %vm3053_vm2, %v2620_v47, %v1030_v38  ;;  %v2651_v17 = vld [vmem:[%s3051_s27 + $0xb8] sm:$0xf]  ;;  %v283_v20 = vld [vmem:[%s3051_s27 + $0x40] sm:$0xf] }
  0x3e   : > { %v1572_v60 = vrot.slane %v1570_v49, 5  ;;  %v1576_v61 = vrot.slane %v1574_v50, 4  ;;  %v1563_v63 = vrot.slane %v1561_v53, 4  ;;  %v1566_v1 = vrot.slane %v1564_v54, 5  ;;  %v2650_v21 = vld [vmem:[%s3051_s27 + $0xb4] sm:$0xf] }
  0x3f   : > { %2199 = vrot.lane.b32.xlu1 %v2136_v16, %s2974_s4  ;;  %v1753_v2 = vshrl.u32 %v2696_v55, 16  ;;  %v1756_v3 = vshll.u32 %v2696_v55, 16  ;;  %v3187_v4 = vrot.slane %v1762_v56, 5  ;;  %v1768_v5 = vrot.slane %v1766_v57, 4  ;;  %v282_v25 = vld [vmem:[%s3051_s27 + $0x3c] sm:$0xf] }
  0x40   : > { %v1577_v7 = vor.u32 %v1576_v61, %v1572_v60  ;;  %v1580_v8 = vshll.u32 %v2674_v62, 16  ;;  %v1567_v11 = vor.u32 %v1566_v1, %v1563_v63  ;;  %v1772_v16 = vshll.u32 %v2698_v9, 16  ;;  %v2720_v29 = vld [vmem:[%s3051_s27 + $0x54] sm:$0xe]  ;;  %v2745_v33 = vld [vmem:[%s3051_s27 + $0xb8] sm:$0xf] }
  0x41   : > { %2197 = vrot.lane.b32.xlu0 %v2133_v22, %s2974_s4  ;;  %v1755_v12 = vrot.slane %v1753_v2, 4  ;;  %v1758_v13 = vrot.slane %v1756_v3, 5  ;;  %v1769_v15 = vor.u32 %v1768_v5, %v3187_v4  ;;  %v2069_v24 = vrot.slane %v2721_v14, 5  ;;  %v306_v42 = vld [vmem:[%s3051_s27 + $0x9c] sm:$0xf] }
  0x42   : > { %v1578_v18 = vrot.slane %v1577_v7, 4  ;;  %v1582_v19 = vrot.slane %v1580_v8, 5  ;;  %v1568_v22 = vrot.slane %v1567_v11, 4  ;;  %v1774_v28 = vrot.slane %v1772_v16, 5  ;;  %v232_v43 = vld [vmem:[%s3051_s27 + $0xb4] sm:$0xf] }
  0x43   : > { %728 = vrot.lane.b32.xlu1 %v485_v26, %s2972_s30  ;;  %v1759_v23 = vor.u32 %v1758_v13, %v1755_v12  ;;  %v2722_v26 = vld [vmem:[%s3051_s27 + $0x5c] sm:$0x1]  ;;  %v1770_v27 = vrot.slane %v1769_v15, 4  ;;  %v452_v31 = vshrl.u32 %v283_v20, 16  ;;  %v439_v34 = vshrl.u32 %v282_v25, 16 }
  0x44   : > { %v1583_v32 = vsel %vm3087_vm5, %v1578_v18, %v1582_v19  ;;  %v442_v35 = vshll.u32 %v282_v25, 16  ;;  %v2071_v38 = vrot.slane %v2069_v24, 4  ;;  %v2072_v40 = vrot.slane %v2722_v26, 5  ;;  %v2746_v45 = vld [vmem:[%s3051_s27 + $0xbc] sm:$0x1] }
  0x45   : > { %726 = vrot.lane.b32.xlu0 %v475_v30, %s2972_s30  ;;  %v448_v30 = vshll.u32 %v283_v20, 16  ;;  %v1760_v37 = vrot.slane %v1759_v23, 4  ;;  %v2756_v41 = vrot.slane %v2720_v29, 9  ;;  %v2125_v46 = vrot.slane %v2745_v33, 5  ;;  %265 = vst.msk [vmem:[#allocation2 + $0x78] sm:$0xf] %vm234_vm6, %v232_v43 }
  0x46   : > { %v454_v49 = vrot.slane %v452_v31, 4  ;;  %v284_v50 = vld [vmem:[%s3051_s27 + $0x44] sm:$0x1]  ;;  %v441_v51 = vrot.slane %v439_v34, 4  ;;  %v631_v56 = vshrl.u32 %v306_v42, 16  ;;  %v634_v57 = vshll.u32 %v306_v42, 16 }
  0x47   : > { %760 = vrot.lane.b32.xlu1 %v677_v36, %s2972_s30  ;;  %v1573_v36 = vsel %vm3087_vm5, %v1568_v22, %v1572_v60  ;;  %v450_v47 = vrot.slane %v448_v30, 5  ;;  %v1765_v55 = vsel %vm3087_vm5, %v1760_v37, %v3187_v4  ;;  %v2744_v60 = vld [vmem:[%s3051_s27 + $0xb4] sm:$0xe]  ;;  %v2073_v61 = vsel %vm3053_vm2, %v2071_v38, %v2072_v40  ;;  %v308_v4 = vld [vmem:[%s3051_s27 + $0xa4] sm:$0x1] }
  0x48   : > { %v2070_v62 = vsel %vm3053_vm2, %v2756_v41, %v2069_v24  ;;  %v2127_v63 = vrot.slane %v2125_v46, 4  ;;  %v2128_v1 = vrot.slane %v2746_v45, 5  ;;  %v458_v3 = vshll.u32 %v284_v50, 16  ;;  %v217_v11 = vld [vmem:[%s3051_s27 + $0x58] sm:$0xf] }
  0x49   : > { %758 = vrot.lane.b32.xlu0 %v667_v39, %s2972_s30  ;;  %v307_v39 = vld [vmem:[%s3051_s27 + $0xa0] sm:$0xf]  ;;  %v455_v2 = vor.u32 %v454_v49, %v450_v47  ;;  %v2764_v7 = vrot.slane %v2744_v60, 9  ;;  %v633_v9 = vrot.slane %v631_v56, 4  ;;  %250 = vst.msk [vmem:[#allocation2 + $0x3c] sm:$0xf] %vm234_vm6, %v217_v11 }
  0x4a   : > { %v640_v53 = vshll.u32 %v307_v39, 16  ;;  %v644_v54 = vshrl.u32 %v307_v39, 16  ;;  %v2129_v12 = vsel %vm3053_vm2, %v2127_v63, %v2128_v1  ;;  %v460_v14 = vrot.slane %v458_v3, 5  ;;  %v847_v20 = vld [vmem:[%s3051_s27 + $0x40] sm:$0xf] }
  0x4b   : > { %1068 = vrot.lane.b32.xlu1 %v978_v44, %s2971_s29  ;;  %v1775_v44 = vsel %vm3087_vm5, %v1770_v27, %v1774_v28  ;;  %v456_v13 = vrot.slane %v455_v2, 4  ;;  %v650_v16 = vshll.u32 %v308_v4, 16  ;;  %v967_v24 = vrot.slane %v847_v20, 5  ;;  %v871_v25 = vld [vmem:[%s3051_s27 + $0xa0] sm:$0xf] }
  0x4c   : > { %v642_v5 = vrot.slane %v640_v53, 5  ;;  %v848_v28 = vld [vmem:[%s3051_s27 + $0x44] sm:$0x1]  ;;  %v846_v29 = vld [vmem:[%s3051_s27 + $0x3c] sm:$0xe]  ;;  %v1023_v30 = vrot.slane %v871_v25, 5 }
  0x4d   : > { %1066 = vrot.lane.b32.xlu0 %v975_v52, %s2971_s29  ;;  %v444_v52 = vrot.slane %v442_v35, 5  ;;  %v652_v23 = vrot.slane %v650_v16, 5  ;;  %v970_v33 = vrot.slane %v848_v28, 5  ;;  %v872_v34 = vld [vmem:[%s3051_s27 + $0xa4] sm:$0x1]  ;;  %v2611_v37 = vrot.slane %v846_v29, 9 }
  0x4e   : > { %v870_v35 = vld [vmem:[%s3051_s27 + $0x9c] sm:$0xe]  ;;  %v2670_v38 = vld [vmem:[%s3051_s27 + $0x4c] sm:$0xf]  ;;  %v2669_v39 = vld [vmem:[%s3051_s27 + $0x48] sm:$0xf] }
  0x4f   : > { %1100 = vrot.lane.b32.xlu1 %v1034_v58, %s2971_s29  ;;  %v216_v58 = vld [vmem:[%s3051_s27 + $0x54] sm:$0xf]  ;;  %v445_v8 = vor.u32 %v444_v52, %v441_v51  ;;  %v215_v40 = vld [vmem:[%s3051_s27 + $0x4c] sm:$0xf]  ;;  %v1025_v41 = vrot.slane %v1023_v30, 4  ;;  %v1026_v42 = vrot.slane %v872_v34, 5  ;;  %v968_v51 = vsel %vm3053_vm2, %v2611_v37, %v967_v24 }
  0x50   : > { %249 = vst.msk [vmem:[#allocation2 + $0x38] sm:$0xf] %vm234_vm6, %v216_v58  ;;  %v2619_v43 = vrot.slane %v870_v35, 9  ;;  %248 = vst.msk [vmem:[#allocation2 + $0x34] sm:$0xf] %vm234_vm6, %v215_v40  ;;  %v1537_v52 = vshrl.u32 %v2669_v39, 16 }
  0x51   : > { %1098 = vrot.lane.b32.xlu0 %v1031_v59, %s2971_s29  ;;  %v233_v59 = vld [vmem:[%s3051_s27 + $0xb8] sm:$0xf]  ;;  %v446_v18 = vrot.slane %v445_v8, 4  ;;  %v2694_v49 = vld [vmem:[%s3051_s27 + $0xac] sm:$0xf]  ;;  %v1540_v53 = vshll.u32 %v2669_v39, 16  ;;  %v1027_v60 = vsel %vm3053_vm2, %v1025_v41, %v1026_v42 }
  0x52   : > { %266 = vst.msk [vmem:[#allocation2 + $0x7c] sm:$0xf] %vm234_vm6, %v233_v59  ;;  %v2693_v50 = vld [vmem:[%s3051_s27 + $0xa8] sm:$0xf]  ;;  %v1738_v56 = vshll.u32 %v2694_v49, 16  ;;  %v1024_v63 = vsel %vm3053_vm2, %v2619_v43, %v1023_v30  ;;  %v1539_v2 = vrot.slane %v1537_v52, 4 }
  0x53   : > { %1265 = vrot.lane.b32.xlu1 %v2635_v6, %s2970_s28  ;;  %v646_v6 = vrot.slane %v644_v54, 4  ;;  %v451_v26 = vsel %vm3087_vm5, %v446_v18, %v450_v47  ;;  %v1550_v47 = vshrl.u32 %v2670_v38, 16  ;;  %v231_v54 = vld [vmem:[%s3051_s27 + $0xac] sm:$0xf]  ;;  %v1729_v58 = vshrl.u32 %v2693_v50, 16 }
  0x54   : > { %264 = vst.msk [vmem:[#allocation2 + $0x74] sm:$0xf] %vm234_vm6, %v231_v54  ;;  %v1732_v59 = vshll.u32 %v2693_v50, 16  ;;  %v2671_v1 = vld [vmem:[%s3051_s27 + $0x50] sm:$0x1]  ;;  %v1542_v3 = vrot.slane %v1540_v53, 5 }
  0x55   : > { %1263 = vrot.lane.b32.xlu0 %v2634_v10, %s2970_s28  ;;  %v636_v10 = vrot.slane %v634_v57, 5  ;;  %v647_v15 = vor.u32 %v646_v6, %v642_v5  ;;  %v1742_v57 = vshrl.u32 %v2694_v49, 16  ;;  %v3287_v4 = vrot.slane %v1738_v56, 5  ;;  %v2633_v8 = vld [vmem:[%s3051_s27 + $0x4c] sm:$0xf] }
  0x56   : > { %v1731_v6 = vrot.slane %v1729_v58, 4  ;;  %v2695_v11 = vld [vmem:[%s3051_s27 + $0xb0] sm:$0x1]  ;;  %v2649_v18 = vld [vmem:[%s3051_s27 + $0xac] sm:$0xf] }
  0x57   : > { %1297 = vrot.lane.b32.xlu1 %v2651_v17, %s2970_s28  ;;  %v2126_v17 = vsel %vm3053_vm2, %v2764_v7, %v2125_v46  ;;  %v637_v19 = vor.u32 %v636_v10, %v633_v9  ;;  %v648_v22 = vrot.slane %v647_v15, 4  ;;  %v1546_v46 = vshll.u32 %v2670_v38, 16  ;;  %v279_v25 = vld [vmem:[%s3051_s27 + $0x30] sm:$0xf]  ;;  %v304_v38 = vld [vmem:[%s3051_s27 + $0x94] sm:$0xf] }
  0x58   : > { %v1734_v7 = vrot.slane %v1732_v59, 5  ;;  %v1556_v10 = vshll.u32 %v2671_v1, 16  ;;  %v1748_v15 = vshll.u32 %v2695_v11, 16  ;;  %v2719_v29 = vld [vmem:[%s3051_s27 + $0x50] sm:$0x1]  ;;  %v418_v37 = vshll.u32 %v279_v25, 16 }
  0x59   : > { %1295 = vrot.lane.b32.xlu0 %v2650_v21, %s2970_s28  ;;  %v461_v21 = vsel %vm3087_vm5, %v456_v13, %v460_v14  ;;  %v638_v27 = vrot.slane %v637_v19, 4  ;;  %v653_v31 = vsel %vm3087_vm5, %v648_v22, %v652_v23  ;;  %v1543_v13 = vor.u32 %v1542_v3, %v1539_v2  ;;  %v280_v23 = vld [vmem:[%s3051_s27 + $0x34] sm:$0xf]  ;;  %v303_v41 = vld [vmem:[%s3051_s27 + $0x90] sm:$0xf] }
  0x5a   : > { %v1735_v16 = vor.u32 %v1734_v7, %v1731_v6  ;;  %v1558_v20 = vrot.slane %v1556_v10, 5  ;;  %v428_v34 = vshrl.u32 %v280_v23, 16  ;;  %v2065_v40 = vrot.slane %v2719_v29, 5  ;;  %v213_v53 = vld [vmem:[%s3051_s27 + $0x40] sm:$0xf] }
  0x5b   : > { %1826 = vrot.lane.b32.xlu1 %v1583_v32, %s2973_s3  ;;  %v969_v32 = vrot.slane %v967_v24, 4  ;;  %v1544_v22 = vrot.slane %v1543_v13, 4  ;;  %v620_v52 = vshrl.u32 %v304_v38, 16  ;;  %v607_v56 = vshrl.u32 %v303_v41, 16  ;;  %246 = vst.msk [vmem:[#allocation2 + $0x2c] sm:$0xf] %vm234_vm6, %v213_v53 }
  0x5c   : > { %v1736_v28 = vrot.slane %v1735_v16, 4  ;;  %v430_v50 = vrot.slane %v428_v34, 4  ;;  %v212_v58 = vld [vmem:[%s3051_s27 + $0x3c] sm:$0xf]  ;;  %v2741_v59 = vld [vmem:[%s3051_s27 + $0xa8] sm:$0xe] }
  0x5d   : > { %1824 = vrot.lane.b32.xlu0 %v1573_v36, %s2973_s3  ;;  %v643_v36 = vsel %vm3087_vm5, %v638_v27, %v642_v5  ;;  %v971_v45 = vsel %vm3053_vm2, %v969_v32, %v970_v33  ;;  %v1744_v5 = vrot.slane %v1742_v57, 4  ;;  %v1750_v27 = vrot.slane %v1748_v15, 5  ;;  %v2742_v32 = vld [vmem:[%s3051_s27 + $0xac] sm:$0xf]  ;;  %245 = vst.msk [vmem:[#allocation2 + $0x28] sm:$0xf] %vm234_vm6, %v212_v58 }
  0x5e   : > { %v424_v33 = vshll.u32 %v280_v23, 16  ;;  %v1741_v43 = vsel %vm3087_vm5, %v1736_v28, %v3287_v4  ;;  %v610_v57 = vshll.u32 %v303_v41, 16  ;;  %v228_v6 = vld [vmem:[%s3051_s27 + $0x9c] sm:$0xf]  ;;  %v2763_v7 = vrot.slane %v2741_v59, 9 }
  0x5f   : > { %1858 = vrot.lane.b32.xlu1 %v1775_v44, %s2973_s3  ;;  %v214_v44 = vld [vmem:[%s3051_s27 + $0x48] sm:$0xf]  ;;  %v1745_v14 = vor.u32 %v1744_v5, %v3287_v4  ;;  %v622_v4 = vrot.slane %v620_v52, 4  ;;  %v229_v5 = vld [vmem:[%s3051_s27 + $0xa0] sm:$0xf]  ;;  %v609_v10 = vrot.slane %v607_v56, 4 }
  0x60   : > { %247 = vst.msk [vmem:[#allocation2 + $0x30] sm:$0xf] %vm234_vm6, %v214_v44  ;;  %v426_v49 = vrot.slane %v424_v33, 5  ;;  %v612_v11 = vrot.slane %v610_v57, 5  ;;  %262 = vst.msk [vmem:[#allocation2 + $0x6c] sm:$0xf] %vm234_vm6, %v229_v5 }
  0x61   : > { %1856 = vrot.lane.b32.xlu0 %v1765_v55, %s2973_s3  ;;  %v230_v55 = vld [vmem:[%s3051_s27 + $0xa8] sm:$0xf]  ;;  %261 = vst.msk [vmem:[#allocation2 + $0x68] sm:$0xf] %vm234_vm6, %v228_v6  ;;  %v868_v28 = vld [vmem:[%s3051_s27 + $0x94] sm:$0xf] }
  0x62   : > { %263 = vst.msk [vmem:[#allocation2 + $0x70] sm:$0xf] %vm234_vm6, %v230_v55  ;;  %v420_v55 = vrot.slane %v418_v37, 5  ;;  %v431_v2 = vor.u32 %v430_v50, %v426_v49  ;;  %v843_v33 = vld [vmem:[%s3051_s27 + $0x30] sm:$0xe]  ;;  %v1016_v34 = vrot.slane %v868_v28, 5 }
  0x63   : > { %2163 = vrot.lane.b32.xlu1 %v2073_v61, %s2974_s4  ;;  %v1548_v61 = vrot.slane %v1546_v46, 5  ;;  %v2118_v46 = vrot.slane %v2742_v32, 5  ;;  %v2610_v41 = vrot.slane %v843_v33, 9  ;;  %v2691_v52 = vld [vmem:[%s3051_s27 + $0xa0] sm:$0xf] }
  0x64   : > { %v2690_v53 = vld [vmem:[%s3051_s27 + $0x9c] sm:$0xf]  ;;  %v2668_v6 = vld [vmem:[%s3051_s27 + $0x44] sm:$0x1] }
  0x65   : > { %2161 = vrot.lane.b32.xlu0 %v2070_v62, %s2974_s4  ;;  %v1552_v62 = vrot.slane %v1550_v47, 4  ;;  %v1549_v35 = vsel %vm3087_vm5, %v1544_v22, %v1548_v61  ;;  %v281_v47 = vld [vmem:[%s3051_s27 + $0x38] sm:$0x1] }
  0x67   : > { %2195 = vrot.lane.b32.xlu1 %v2129_v12, %s2974_s4  ;;  %v1553_v9 = vor.u32 %v1552_v62, %v1548_v61  ;;  %v2632_v12 = vld [vmem:[%s3051_s27 + $0x48] sm:$0xf]  ;;  %v2120_v61 = vrot.slane %v2118_v46, 4 }
  0x69   : > { %2193 = vrot.lane.b32.xlu0 %v2126_v17, %s2974_s4  ;;  %v2718_v17 = vld [vmem:[%s3051_s27 + $0x4c] sm:$0xf]  ;;  %v1554_v19 = vrot.slane %v1553_v9, 4  ;;  %v305_v9 = vld [vmem:[%s3051_s27 + $0x98] sm:$0x1] }
  0x6a   : > { %v2062_v24 = vrot.slane %v2718_v17, 5  ;;  %v626_v17 = vshll.u32 %v305_v9, 16  ;;  %v211_v9 = vld [vmem:[%s3051_s27 + $0x34] sm:$0xf] }
  0x6b   : > { %724 = vrot.lane.b32.xlu1 %v461_v21, %s2972_s30  ;;  %v2648_v21 = vld [vmem:[%s3051_s27 + $0xa8] sm:$0xf]  ;;  %v1559_v30 = vsel %vm3087_vm5, %v1554_v19, %v1558_v20  ;;  %v613_v20 = vor.u32 %v612_v11, %v609_v10  ;;  %v2631_v11 = vld [vmem:[%s3051_s27 + $0x40] sm:$0xf]  ;;  %244 = vst.msk [vmem:[#allocation2 + $0x24] sm:$0xf] %vm234_vm6, %v211_v9 }
  0x6c   : > { %v2064_v39 = vrot.slane %v2062_v24, 4 }
  0x6d   : > { %722 = vrot.lane.b32.xlu0 %v451_v26, %s2972_s30  ;;  %v1746_v26 = vrot.slane %v1745_v14, 4  ;;  %v432_v14 = vrot.slane %v431_v2, 4 }
  0x6f   : > { %756 = vrot.lane.b32.xlu1 %v653_v31, %s2972_s30  ;;  %v2717_v31 = vld [vmem:[%s3051_s27 + $0x48] sm:$0xe]  ;;  %v1751_v42 = vsel %vm3087_vm5, %v1746_v26, %v1750_v27  ;;  %v628_v26 = vrot.slane %v626_v17, 5 }
  0x70   : > { %v2755_v44 = vrot.slane %v2717_v31, 9  ;;  %v845_v31 = vld [vmem:[%s3051_s27 + $0x38] sm:$0x1] }
  0x71   : > { %754 = vrot.lane.b32.xlu0 %v643_v36, %s2972_s30  ;;  %v415_v36 = vshrl.u32 %v279_v25, 16 }
  0x72   : > { %v2063_v1 = vsel %vm3053_vm2, %v2755_v44, %v2062_v24  ;;  %v867_v44 = vld [vmem:[%s3051_s27 + $0x90] sm:$0xe] }
  0x73   : > { %1064 = vrot.lane.b32.xlu1 %v971_v45, %s2971_s29  ;;  %v2743_v45 = vld [vmem:[%s3051_s27 + $0xb0] sm:$0x1]  ;;  %v417_v54 = vrot.slane %v415_v36, 4  ;;  %v2618_v56 = vrot.slane %v867_v44, 9 }
  0x74   : > { %v2121_v62 = vrot.slane %v2743_v45, 5  ;;  %v2666_v45 = vld [vmem:[%s3051_s27 + $0x3c] sm:$0xf] }
  0x75   : > { %1062 = vrot.lane.b32.xlu0 %v968_v51, %s2971_s29  ;;  %v616_v51 = vshll.u32 %v304_v38, 16  ;;  %v963_v38 = vrot.slane %v845_v31, 5  ;;  %v1513_v57 = vshrl.u32 %v2666_v45, 16  ;;  %v1516_v58 = vshll.u32 %v2666_v45, 16  ;;  %v2714_v45 = vld [vmem:[%s3051_s27 + $0x3c] sm:$0xe] }
  0x76   : > { %v2122_v13 = vsel %vm3053_vm2, %v2120_v61, %v2121_v62  ;;  %v1718_v61 = vshrl.u32 %v2691_v52, 16  ;;  %v1705_v62 = vshrl.u32 %v2690_v53, 16  ;;  %v1017_v5 = vsel %vm3053_vm2, %v2618_v56, %v1016_v34 }
  0x77   : > { %1096 = vrot.lane.b32.xlu1 %v1027_v60, %s2971_s29  ;;  %v2066_v60 = vsel %vm3053_vm2, %v2064_v39, %v2065_v40  ;;  %v618_v3 = vrot.slane %v616_v51, 5  ;;  %v869_v39 = vld [vmem:[%s3051_s27 + $0x98] sm:$0x1] }
  0x79   : > { %1094 = vrot.lane.b32.xlu0 %v1024_v63, %s2971_s29  ;;  %v434_v63 = vshll.u32 %v281_v47, 16  ;;  %v623_v16 = vor.u32 %v622_v4, %v618_v3  ;;  %v1019_v47 = vrot.slane %v869_v39, 5  ;;  %v276_v39 = vld [vmem:[%s3051_s27 + $0x24] sm:$0xf] }
  0x7b   : > { %1261 = vrot.lane.b32.xlu1 %v2633_v8, %s2970_s28  ;;  %v421_v8 = vor.u32 %v420_v55, %v417_v54  ;;  %v436_v15 = vrot.slane %v434_v63, 5  ;;  %v624_v25 = vrot.slane %v623_v16, 4  ;;  %v1708_v63 = vshll.u32 %v2690_v53, 16 }
  0x7c   : > { %v1707_v16 = vrot.slane %v1705_v62, 4  ;;  %v394_v53 = vshll.u32 %v276_v39, 16 }
  0x7d   : > { %1259 = vrot.lane.b32.xlu0 %v2632_v12, %s2970_s28  ;;  %v422_v19 = vrot.slane %v421_v8, 4  ;;  %v437_v24 = vsel %vm3087_vm5, %v432_v14, %v436_v15  ;;  %v629_v36 = vsel %vm3087_vm5, %v624_v25, %v628_v26  ;;  %v1518_v8 = vrot.slane %v1516_v58, 5  ;;  %v2630_v25 = vld [vmem:[%s3051_s27 + $0x3c] sm:$0xf]  ;;  %v300_v58 = vld [vmem:[%s3051_s27 + $0x84] sm:$0xf] }
  0x7e   : > { %v1720_v15 = vrot.slane %v1718_v61, 4  ;;  %v1710_v17 = vrot.slane %v1708_v63, 5  ;;  %v2754_v61 = vrot.slane %v2714_v45, 9  ;;  %v2740_v63 = vld [vmem:[%s3051_s27 + $0xa4] sm:$0x1]  ;;  %v583_v9 = vshrl.u32 %v300_v58, 16 }
  0x7f   : > { %1293 = vrot.lane.b32.xlu1 %v2649_v18, %s2970_s28  ;;  %v2119_v18 = vsel %vm3053_vm2, %v2763_v7, %v2118_v46  ;;  %v427_v29 = vsel %vm3087_vm5, %v422_v19, %v426_v49  ;;  %v1018_v46 = vrot.slane %v1016_v34, 4  ;;  %v1515_v7 = vrot.slane %v1513_v57, 4  ;;  %v2646_v34 = vld [vmem:[%s3051_s27 + $0x9c] sm:$0xf] }
  0x81   : > { %1291 = vrot.lane.b32.xlu0 %v2648_v21, %s2970_s28  ;;  %v844_v21 = vld [vmem:[%s3051_s27 + $0x34] sm:$0xf]  ;;  %v1519_v26 = vor.u32 %v1518_v8, %v1515_v7  ;;  %v396_v8 = vrot.slane %v394_v53, 5  ;;  %v225_v53 = vld [vmem:[%s3051_s27 + $0x88] sm:$0xf] }
  0x82   : > { %v960_v27 = vrot.slane %v844_v21, 5  ;;  %v2692_v21 = vld [vmem:[%s3051_s27 + $0xa4] sm:$0x1]  ;;  %258 = vst.msk [vmem:[#allocation2 + $0x5c] sm:$0xf] %vm234_vm6, %v225_v53 }
  0x83   : > { %1822 = vrot.lane.b32.xlu1 %v1559_v30, %s2973_s3  ;;  %v614_v30 = vrot.slane %v613_v20, 4  ;;  %v1532_v20 = vshll.u32 %v2668_v6, 16  ;;  %v1724_v28 = vshll.u32 %v2692_v21, 16  ;;  %v278_v6 = vld [vmem:[%s3051_s27 + $0x2c] sm:$0x1] }
  0x84   : > { %v962_v37 = vrot.slane %v960_v27, 4  ;;  %v961_v55 = vsel %vm3053_vm2, %v2610_v41, %v960_v27 }
  0x85   : > { %1820 = vrot.lane.b32.xlu0 %v1549_v35, %s2973_s3  ;;  %v619_v40 = vsel %vm3087_vm5, %v614_v30, %v618_v3  ;;  %v2647_v30 = vld [vmem:[%s3051_s27 + $0xa0] sm:$0xf]  ;;  %v1726_v41 = vrot.slane %v1724_v28, 5 }
  0x86   : > { %v964_v49 = vsel %vm3053_vm2, %v962_v37, %v963_v38 }
  0x87   : > { %1854 = vrot.lane.b32.xlu1 %v1751_v42, %s2973_s3  ;;  %v2667_v42 = vld [vmem:[%s3051_s27 + $0x40] sm:$0xf] }
  0x88   : > { %v1522_v50 = vshll.u32 %v2667_v42, 16  ;;  %v1526_v51 = vshrl.u32 %v2667_v42, 16 }
  0x89   : > { %1852 = vrot.lane.b32.xlu0 %v1741_v43, %s2973_s3 }
  0x8a   : > { %v3383_v2 = vrot.slane %v1522_v50, 5  ;;  %v1528_v3 = vrot.slane %v1526_v51, 4 }
  0x8b   : > { %2159 = vrot.lane.b32.xlu1 %v2066_v60, %s2974_s4  ;;  %v1714_v60 = vshll.u32 %v2691_v52, 16  ;;  %v391_v52 = vshrl.u32 %v276_v39, 16  ;;  %v209_v39 = vld [vmem:[%s3051_s27 + $0x28] sm:$0xf] }
  0x8c   : > { %v3337_v12 = vpop.permute.xlu1 %1269  ;;  %v1529_v19 = vor.u32 %v1528_v3, %v3383_v2  ;;  %242 = vst.msk [vmem:[#allocation2 + $0x1c] sm:$0xf] %vm234_vm6, %v209_v39 }
  0x8d   : > { %2157 = vrot.lane.b32.xlu0 %v2063_v1, %s2974_s4  ;;  %v1020_v1 = vsel %vm3053_vm2, %v1018_v46, %v1019_v47  ;;  %v3397_v14 = vrot.slane %v1714_v60, 5  ;;  %v3431_v46 = vld [vmem:[%s3051_s27 + $0xa0] sm:$0xf]  ;;  %v393_v7 = vrot.slane %v391_v52, 4 }
  0x8e   : > { %v1530_v31 = vrot.slane %v1529_v19, 4  ;;  %v2111_v62 = vrot.slane %v3431_v46, 5  ;;  %v410_v19 = vshll.u32 %v278_v6, 16  ;;  %v2663_v6 = vld [vmem:[%s3051_s27 + $0x30] sm:$0xf] }
  0x8f   : > { %v1071_v22 = vpop.permute.xlu0 %1070  ;;  %2191 = vrot.lane.b32.xlu1 %v2122_v13, %s2974_s4  ;;  %v210_v13 = vld [vmem:[%s3051_s27 + $0x30] sm:$0xf]  ;;  %v1721_v27 = vor.u32 %v1720_v15, %v3397_v14 }
  0x90   : > { %243 = vst.msk [vmem:[#allocation2 + $0x20] sm:$0xf] %vm234_vm6, %v210_v13  ;;  %v2738_v13 = vld [vmem:[%s3051_s27 + $0x9c] sm:$0xe] }
  0x91   : > { %v3347_v23 = vpop.permute.xlu1 %1072  ;;  %2189 = vrot.lane.b32.xlu0 %v2119_v18, %s2974_s4  ;;  %v227_v18 = vld [vmem:[%s3051_s27 + $0x94] sm:$0xf] }
  0x92   : > { %260 = vst.msk [vmem:[#allocation2 + $0x64] sm:$0xf] %vm234_vm6, %v227_v18 }
  0x93   : > { %v1103_v32 = vpop.permute.xlu0 %1102  ;;  %720 = vrot.lane.b32.xlu1 %v437_v24, %s2972_s30 }
  0x95   : > { %v1105_v35 = vpop.permute.xlu1 %1104  ;;  %718 = vrot.lane.b32.xlu0 %v427_v29, %s2972_s30  ;;  %v1711_v29 = vor.u32 %v1710_v17, %v1707_v16  ;;  %v2113_v16 = vrot.slane %v2111_v62, 4  ;;  %v2114_v17 = vrot.slane %v2740_v63, 5 }
  0x97   : > { %v1268_v43 = vpop.permute.xlu0 %1267  ;;  %752 = vrot.lane.b32.xlu1 %v629_v36, %s2972_s30  ;;  %v277_v36 = vld [vmem:[%s3051_s27 + $0x28] sm:$0xf]  ;;  %v1712_v42 = vrot.slane %v1711_v29, 4  ;;  %v2115_v29 = vsel %vm3053_vm2, %v2113_v16, %v2114_v17 }
  0x98   : > { %v400_v47 = vshll.u32 %v277_v36, 16 }
  0x99   : > { %750 = vrot.lane.b32.xlu0 %v619_v40, %s2972_s30  ;;  %v763_v54 = vpop.permute.xlu1 %762  ;;  %v1722_v40 = vrot.slane %v1721_v27, 4  ;;  %v1717_v60 = vsel %vm3087_vm5, %v1712_v42, %v3397_v14 }
  0x9a   : > { %829 = vst.msk [vmem:[#allocation2 + $0x78] sm:$0xf] %vm798_vm7, %v763_v54  ;;  %v301_v54 = vld [vmem:[%s3051_s27 + $0x88] sm:$0xf] }
  0x9b   : > { %v731_v59 = vpop.permute.xlu0 %730  ;;  %1169 = vst.msk [vmem:[#allocation2 + $0x78] sm:$0xf] %vm1138_vm8, %v1103_v32  ;;  %1060 = vrot.lane.b32.xlu1 %v964_v49, %s2971_s29  ;;  %v1534_v32 = vrot.slane %v1532_v20, 5  ;;  %v404_v49 = vshrl.u32 %v277_v36, 16  ;;  %v592_v3 = vshll.u32 %v301_v54, 16 }
  0x9c   : > { %813 = vst.msk [vmem:[#allocation2 + $0x38] sm:$0xf] %vm798_vm7, %v731_v59  ;;  %v1727_v59 = vsel %vm3087_vm5, %v1722_v40, %v1726_v41  ;;  %v842_v40 = vld [vmem:[%s3051_s27 + $0x2c] sm:$0x1]  ;;  %v208_v41 = vld [vmem:[%s3051_s27 + $0x24] sm:$0xf] }
  0x9d   : > { %1153 = vst.msk [vmem:[#allocation2 + $0x38] sm:$0xf] %vm1138_vm8, %v1071_v22  ;;  %1058 = vrot.lane.b32.xlu0 %v961_v55, %s2971_s29  ;;  %v765_v4 = vpop.permute.xlu1 %764  ;;  %v226_v22 = vld [vmem:[%s3051_s27 + $0x90] sm:$0xf]  ;;  %v1535_v44 = vsel %vm3087_vm5, %v1530_v31, %v1534_v32  ;;  %v3462_v20 = vrot.slane %v592_v3, 5 }
  0x9e   : > { %1350 = vst.msk [vmem:[#allocation2 + $0x38] sm:$0xf] %vm1335_vm9, %v1268_v43  ;;  %v2716_v43 = vld [vmem:[%s3051_s27 + $0x44] sm:$0x1]  ;;  %v2664_v3 = vld [vmem:[%s3051_s27 + $0x34] sm:$0xf] }
  0x9f   : > { %830 = vst.msk [vmem:[#allocation2 + $0x7c] sm:$0xf] %vm798_vm7, %v765_v4  ;;  %v733_v10 = vpop.permute.xlu0 %732  ;;  %1092 = vrot.lane.b32.xlu1 %v1020_v1, %s2971_s29  ;;  %v2058_v57 = vrot.slane %v2716_v43, 5  ;;  %v3449_v1 = vrot.slane %v400_v47, 5  ;;  %v596_v4 = vshrl.u32 %v301_v54, 16 }
  0xa0   : > { %1170 = vst.msk [vmem:[#allocation2 + $0x7c] sm:$0xf] %vm1138_vm8, %v1105_v35  ;;  %v1520_v35 = vrot.slane %v1519_v26, 4  ;;  %v302_v26 = vld [vmem:[%s3051_s27 + $0x8c] sm:$0x1] }
  0xa1   : > { %814 = vst.msk [vmem:[#allocation2 + $0x3c] sm:$0xf] %vm798_vm7, %v733_v10  ;;  %1090 = vrot.lane.b32.xlu0 %v1017_v5, %s2971_s29  ;;  %v1302_v24 = vpop.permute.xlu1 %1301  ;;  %v586_v10 = vshll.u32 %v300_v58, 16  ;;  %v598_v21 = vrot.slane %v596_v4, 4  ;;  %v602_v32 = vshll.u32 %v302_v26, 16 }
  0xa2   : > { %1154 = vst.msk [vmem:[#allocation2 + $0x3c] sm:$0xf] %vm1138_vm8, %v3347_v23  ;;  %v1525_v51 = vsel %vm3087_vm5, %v1520_v35, %v3383_v2  ;;  %v406_v2 = vrot.slane %v404_v49, 4  ;;  %v840_v47 = vld [vmem:[%s3051_s27 + $0x24] sm:$0xe] }
  0xa3   : > { %1351 = vst.msk [vmem:[#allocation2 + $0x3c] sm:$0xf] %vm1335_vm9, %v3337_v12  ;;  %1367 = vst.msk [vmem:[#allocation2 + $0x7c] sm:$0xf] %vm1335_vm9, %v1302_v24  ;;  %v1300_v23 = vpop.permute.xlu0 %1299  ;;  %1257 = vrot.lane.b32.xlu1 %v2631_v11, %s2970_s28  ;;  %v2715_v12 = vld [vmem:[%s3051_s27 + $0x40] sm:$0xf]  ;;  %v599_v31 = vor.u32 %v598_v21, %v3462_v20 }
  0xa4   : > { %259 = vst.msk [vmem:[#allocation2 + $0x60] sm:$0xf] %vm234_vm6, %v226_v22  ;;  %v2055_v38 = vrot.slane %v2715_v12, 5  ;;  %v407_v18 = vor.u32 %v406_v2, %v3449_v1  ;;  %v2762_v24 = vrot.slane %v2738_v13, 9  ;;  %v588_v27 = vrot.slane %v586_v10, 5 }
  0xa5   : > { %1366 = vst.msk [vmem:[#allocation2 + $0x78] sm:$0xf] %vm1335_vm9, %v1300_v23  ;;  %1255 = vrot.lane.b32.xlu0 %v2630_v25, %s2970_s28  ;;  %v1831_v33 = vpop.permute.xlu1 %1830  ;;  %v397_v25 = vor.u32 %v396_v8, %v393_v7  ;;  %v585_v23 = vrot.slane %v583_v9, 4  ;;  %v604_v45 = vrot.slane %v602_v32, 5  ;;  %v865_v49 = vld [vmem:[%s3051_s27 + $0x88] sm:$0xf] }
  0xa6   : > { %1912 = vst.msk [vmem:[#allocation2 + $0x3c] sm:$0xf] %vm1896_vm10, %v1831_v33  ;;  %v2057_v56 = vrot.slane %v2055_v38, 4  ;;  %v2056_v15 = vsel %vm3053_vm2, %v2754_v61, %v2055_v38  ;;  %v408_v12 = vrot.slane %v407_v18, 4  ;;  %v956_v61 = vrot.slane %v842_v40, 5 }
  0xa7   : > { %v1829_v37 = vpop.permute.xlu0 %1828  ;;  %1289 = vrot.lane.b32.xlu1 %v2647_v30, %s2970_s28  ;;  %v412_v30 = vrot.slane %v410_v19, 5  ;;  %v398_v35 = vrot.slane %v397_v25, 4  ;;  %v589_v36 = vor.u32 %v588_v27, %v585_v23  ;;  %241 = vst.msk [vmem:[#allocation2 + $0x18] sm:$0xf] %vm234_vm6, %v208_v41  ;;  %v2609_v2 = vrot.slane %v840_v47, 9 }
  0xa8   : > { %1911 = vst.msk [vmem:[#allocation2 + $0x38] sm:$0xf] %vm1896_vm10, %v1829_v37  ;;  %v2059_v14 = vsel %vm3053_vm2, %v2057_v56, %v2058_v57  ;;  %v841_v37 = vld [vmem:[%s3051_s27 + $0x28] sm:$0xf]  ;;  %v224_v56 = vld [vmem:[%s3051_s27 + $0x84] sm:$0xf] }
  0xa9   : > { %1287 = vrot.lane.b32.xlu0 %v2646_v34, %s2970_s28  ;;  %v1863_v50 = vpop.permute.xlu1 %1862  ;;  %v2112_v34 = vsel %vm3053_vm2, %v2762_v24, %v2111_v62  ;;  %v413_v42 = vsel %vm3087_vm5, %v408_v12, %v412_v30  ;;  %v953_v46 = vrot.slane %v841_v37, 5  ;;  %v590_v52 = vrot.slane %v589_v36, 4  ;;  %257 = vst.msk [vmem:[#allocation2 + $0x58] sm:$0xf] %vm234_vm6, %v224_v56  ;;  %v866_v62 = vld [vmem:[%s3051_s27 + $0x8c] sm:$0x1] }
  0xaa   : > { %1928 = vst.msk [vmem:[#allocation2 + $0x7c] sm:$0xf] %vm1896_vm10, %v1863_v50  ;;  %v1009_v57 = vrot.slane %v865_v49, 5  ;;  %v1012_v8 = vrot.slane %v866_v62, 5  ;;  %v1498_v10 = vshll.u32 %v2664_v3, 16  ;;  %v1489_v18 = vshrl.u32 %v2663_v6, 16 }
  0xab   : > { %v1861_v55 = vpop.permute.xlu0 %1860  ;;  %1818 = vrot.lane.b32.xlu1 %v1535_v44, %s2973_s3  ;;  %v600_v44 = vrot.slane %v599_v31, 4  ;;  %v2688_v13 = vld [vmem:[%s3051_s27 + $0x94] sm:$0xf]  ;;  %v954_v16 = vsel %vm3053_vm2, %v2609_v2, %v953_v46  ;;  %v1492_v19 = vshll.u32 %v2663_v6, 16  ;;  %v2665_v12 = vld [vmem:[%s3051_s27 + $0x38] sm:$0x1] }
  0xac   : > { %1927 = vst.msk [vmem:[#allocation2 + $0x78] sm:$0xf] %vm1896_vm10, %v1861_v55  ;;  %v1011_v7 = vrot.slane %v1009_v57, 4  ;;  %v1690_v21 = vshll.u32 %v2688_v13, 16  ;;  %v3526_v23 = vrot.slane %v1498_v10, 5  ;;  %v1491_v30 = vrot.slane %v1489_v18, 4 }
  0xad   : > { %1816 = vrot.lane.b32.xlu0 %v1525_v51, %s2973_s3  ;;  %v2168_v5 = vpop.permute.xlu1 %2167  ;;  %v403_v51 = vsel %vm3087_vm5, %v398_v35, %v3449_v1  ;;  %v595_v1 = vsel %vm3087_vm5, %v590_v52, %v3462_v20  ;;  %v1494_v31 = vrot.slane %v1492_v19, 5  ;;  %v2629_v37 = vld [vmem:[%s3051_s27 + $0x34] sm:$0xf]  ;;  %v1508_v39 = vshll.u32 %v2665_v12, 16  ;;  %v2689_v40 = vld [vmem:[%s3051_s27 + $0x98] sm:$0x1] }
  0xae   : > { %2249 = vst.msk [vmem:[#allocation2 + $0x3c] sm:$0xf] %vm2233_vm11, %v2168_v5  ;;  %v864_v5 = vld [vmem:[%s3051_s27 + $0x84] sm:$0xe]  ;;  %v1013_v26 = vsel %vm3053_vm2, %v1011_v7, %v1012_v8  ;;  %v3546_v49 = vld [vmem:[%s3051_s27 + $0x34] sm:$0xf] }
  0xaf   : > { %v2166_v11 = vpop.permute.xlu0 %2165  ;;  %1850 = vrot.lane.b32.xlu1 %v1727_v59, %s2973_s3  ;;  %v605_v59 = vsel %vm3087_vm5, %v600_v44, %v604_v45  ;;  %v2617_v17 = vrot.slane %v864_v5, 9  ;;  %v1510_v52 = vrot.slane %v1508_v39, 5  ;;  %v274_v56 = vld [vmem:[%s3051_s27 + $0x1c] sm:$0xf]  ;;  %v2711_v2 = vld [vmem:[%s3051_s27 + $0x30] sm:$0xe] }
  0xb0   : > { %2248 = vst.msk [vmem:[#allocation2 + $0x38] sm:$0xf] %vm2233_vm11, %v2166_v11  ;;  %v1502_v11 = vshrl.u32 %v2664_v3, 16  ;;  %v3563_v3 = vld [vmem:[%s3051_s27 + $0x94] sm:$0xf]  ;;  %v380_v5 = vshrl.u32 %v274_v56, 16 }
  0xb1   : > { %1848 = vrot.lane.b32.xlu0 %v1717_v60, %s2973_s3  ;;  %v2200_v22 = vpop.permute.xlu1 %2199  ;;  %v955_v60 = vrot.slane %v953_v46, 4  ;;  %v1700_v46 = vshll.u32 %v2689_v40, 16  ;;  %v298_v10 = vld [vmem:[%s3051_s27 + $0x7c] sm:$0xf]  ;;  %v2753_v18 = vrot.slane %v2711_v2, 9 }
  0xb2   : > { %2265 = vst.msk [vmem:[#allocation2 + $0x7c] sm:$0xf] %vm2233_vm11, %v2200_v22  ;;  %v1694_v22 = vshrl.u32 %v2688_v13, 16  ;;  %v1504_v27 = vrot.slane %v1502_v11, 4  ;;  %v2737_v19 = vld [vmem:[%s3051_s27 + $0x98] sm:$0x1] }
  0xb3   : > { %v2198_v28 = vpop.permute.xlu0 %2197  ;;  %2155 = vrot.lane.b32.xlu1 %v2059_v14, %s2974_s4  ;;  %v957_v9 = vsel %vm3053_vm2, %v955_v60, %v956_v61  ;;  %v2687_v14 = vld [vmem:[%s3051_s27 + $0x90] sm:$0xf]  ;;  %v1702_v61 = vrot.slane %v1700_v46, 5 }
  0xb4   : > { %2264 = vst.msk [vmem:[#allocation2 + $0x78] sm:$0xf] %vm2233_vm11, %v2198_v28  ;;  %v1681_v24 = vshrl.u32 %v2687_v14, 16  ;;  %v1684_v25 = vshll.u32 %v2687_v14, 16 }
  0xb5   : > { %2153 = vrot.lane.b32.xlu0 %v2056_v15, %s2974_s4  ;;  %v729_v33 = vpop.permute.xlu1 %728 }
  0xb6   : > { %812 = vst.msk [vmem:[#allocation2 + $0x34] sm:$0xf] %vm798_vm7, %v729_v33  ;;  %v3534_v33 = vrot.slane %v1690_v21, 5  ;;  %v1683_v35 = vrot.slane %v1681_v24, 4  ;;  %v1686_v36 = vrot.slane %v1684_v25, 5  ;;  %v382_v25 = vrot.slane %v380_v5, 4 }
  0xb7   : > { %v727_v38 = vpop.permute.xlu0 %726  ;;  %2187 = vrot.lane.b32.xlu1 %v2115_v29, %s2974_s4  ;;  %v2877_v43 = vld [vmem:[#allocation2 + $0x38] sm:$0xff]   ;;  %v1010_v29 = vsel %vm3053_vm2, %v2617_v17, %v1009_v57  ;;  %v2735_v21 = vld [vmem:[%s3051_s27 + $0x90] sm:$0xe] }
  0xb8   : > { %811 = vst.msk [vmem:[#allocation2 + $0x30] sm:$0xf] %vm798_vm7, %v727_v38  ;;  %v2405_v58 = vsel %vm2379_vm12, %v2877_v43, 0  ;;  %v1505_v38 = vor.u32 %v1504_v27, %v3526_v23  ;;  %v1495_v43 = vor.u32 %v1494_v31, %v1491_v30  ;;  %v1687_v47 = vor.u32 %v1686_v36, %v1683_v35  ;;  %v207_v31 = vld [vmem:[%s3051_s27 + $0x1c] sm:$0xf] }
  0xb9   : > { %2185 = vrot.lane.b32.xlu0 %v2112_v34, %s2974_s4  ;;  %v761_v50 = vpop.permute.xlu1 %760  ;;  %v1696_v34 = vrot.slane %v1694_v22, 4  ;;  %v275_v22 = vld [vmem:[%s3051_s27 + $0x20] sm:$0x1]  ;;  %240 = vst.msk [vmem:[#allocation2 + $0x14] sm:$0xf] %vm234_vm6, %v207_v31  ;;  %v2107_v36 = vrot.slane %v2737_v19, 5 }
  0xba   : > { %828 = vst.msk [vmem:[#allocation2 + $0x74] sm:$0xf] %vm798_vm7, %v761_v50  ;;  %v2645_v50 = vld [vmem:[%s3051_s27 + $0x94] sm:$0xf]  ;;  %v1688_v62 = vrot.slane %v1687_v47, 4  ;;  %v386_v39 = vshll.u32 %v275_v22, 16 }
  0xbb   : > { %v759_v54 = vpop.permute.xlu0 %758  ;;  %v2876_v55 = vld [vmem:[#allocation2 + $0x78] sm:$0xff]   ;;  %716 = vrot.lane.b32.xlu1 %v413_v42, %s2972_s30  ;;  %v2628_v42 = vld [vmem:[%s3051_s27 + $0x30] sm:$0xf]  ;;  %v1697_v45 = vor.u32 %v1696_v34, %v3534_v33  ;;  %v863_v19 = vld [vmem:[%s3051_s27 + $0x80] sm:$0x1] }
  0xbc   : > { %827 = vst.msk [vmem:[#allocation2 + $0x70] sm:$0xf] %vm798_vm7, %v759_v54  ;;  %2807 = vmatprep.subr.msk.bf16.mxu0 %vm2379_vm12, %v2876_v55  ;;  %v2644_v54 = vld [vmem:[%s3051_s27 + $0x90] sm:$0xf]  ;;  %v1496_v55 = vrot.slane %v1495_v43, 4  ;;  %v1693_v17 = vsel %vm3087_vm5, %v1688_v62, %v3534_v33 }
  0xbd   : > { %714 = vrot.lane.b32.xlu0 %v403_v51, %s2972_s30  ;;  %v1069_v63 = vpop.permute.xlu1 %1068  ;;  %2790 = vmatpush3.bf16.xpose.msra.mxu0 %v2405_v58  ;;  %v1506_v51 = vrot.slane %v1505_v38, 4  ;;  %v2048_v58 = vrot.slane %v3546_v49, 5  ;;  %v1698_v60 = vrot.slane %v1697_v45, 4  ;;  %v206_v33 = vld [vmem:[%s3051_s27 + $0x18] sm:$0xf] }
  0xbe   : > { %1152 = vst.msk [vmem:[#allocation2 + $0x34] sm:$0xf] %vm1138_vm8, %v1069_v63  ;;  %v2713_v63 = vld [vmem:[%s3051_s27 + $0x38] sm:$0x1]  ;;  %v1501_v7 = vsel %vm3087_vm5, %v1496_v55, %v3526_v23  ;;  %v572_v23 = vshrl.u32 %v298_v10, 16 }
  0xbf   : > { %v1067_v4 = vpop.permute.xlu0 %1066  ;;  %748 = vrot.lane.b32.xlu1 %v605_v59, %s2972_s30  ;;  %v273_v59 = vld [vmem:[%s3051_s27 + $0x18] sm:$0xf]  ;;  %v2050_v13 = vrot.slane %v2048_v58, 4  ;;  %v2051_v14 = vrot.slane %v2713_v63, 5  ;;  %239 = vst.msk [vmem:[#allocation2 + $0x10] sm:$0xf] %vm234_vm6, %v206_v33  ;;  %v2049_v43 = vsel %vm3053_vm2, %v2753_v18, %v2048_v58 }
  0xc0   : > { %1151 = vst.msk [vmem:[#allocation2 + $0x30] sm:$0xf] %vm1138_vm8, %v1067_v4  ;;  %v376_v4 = vshll.u32 %v274_v56, 16  ;;  %v367_v8 = vshrl.u32 %v273_v59, 16  ;;  %v299_v45 = vld [vmem:[%s3051_s27 + $0x80] sm:$0x1] }
  0xc1   : > { %746 = vrot.lane.b32.xlu0 %v595_v1, %s2972_s30  ;;  %v1101_v15 = vpop.permute.xlu1 %1100  ;;  %v1511_v1 = vsel %vm3087_vm5, %v1506_v51, %v1510_v52  ;;  %v2052_v34 = vsel %vm3053_vm2, %v2050_v13, %v2051_v14  ;;  %v223_v49 = vld [vmem:[%s3051_s27 + $0x7c] sm:$0xf]  ;;  %v222_v51 = vld [vmem:[%s3051_s27 + $0x78] sm:$0xf]  ;;  %v578_v56 = vshll.u32 %v299_v45, 16 }
  0xc2   : > { %1168 = vst.msk [vmem:[#allocation2 + $0x74] sm:$0xf] %vm1138_vm8, %v1101_v15  ;;  %v297_v15 = vld [vmem:[%s3051_s27 + $0x78] sm:$0xf]  ;;  %v3583_v24 = vrot.slane %v376_v4, 5 }
  0xc3   : > { %v1099_v20 = vpop.permute.xlu0 %1098  ;;  %1056 = vrot.lane.b32.xlu1 %v957_v9, %s2971_s29  ;;  %v370_v9 = vshll.u32 %v273_v59, 16  ;;  %v559_v12 = vshrl.u32 %v297_v15, 16  ;;  %v562_v30 = vshll.u32 %v297_v15, 16  ;;  %256 = vst.msk [vmem:[#allocation2 + $0x54] sm:$0xf] %vm234_vm6, %v223_v49 }
  0xc4   : > { %1167 = vst.msk [vmem:[#allocation2 + $0x70] sm:$0xf] %vm1138_vm8, %v1099_v20  ;;  %v2104_v20 = vrot.slane %v3563_v3, 5  ;;  %v383_v38 = vor.u32 %v382_v25, %v3583_v24  ;;  %v580_v3 = vrot.slane %v578_v56, 5  ;;  %v862_v5 = vld [vmem:[%s3051_s27 + $0x7c] sm:$0xf] }
  0xc5   : > { %1054 = vrot.lane.b32.xlu0 %v954_v16, %s2971_s29  ;;  %v1266_v28 = vpop.permute.xlu1 %1265  ;;  %v1703_v16 = vsel %vm3087_vm5, %v1698_v60, %v1702_v61  ;;  %v561_v46 = vrot.slane %v559_v12, 4  ;;  %v564_v47 = vrot.slane %v562_v30, 5  ;;  %255 = vst.msk [vmem:[#allocation2 + $0x50] sm:$0xf] %vm234_vm6, %v222_v51  ;;  %v838_v61 = vld [vmem:[%s3051_s27 + $0x1c] sm:$0xf] }
  0xc6   : > { %1349 = vst.msk [vmem:[#allocation2 + $0x34] sm:$0xf] %vm1335_vm9, %v1266_v28  ;;  %v369_v28 = vrot.slane %v367_v8, 4  ;;  %v2106_v35 = vrot.slane %v2104_v20, 4  ;;  %v946_v4 = vrot.slane %v838_v61, 5  ;;  %v1002_v14 = vrot.slane %v862_v5, 5 }
  0xc7   : > { %v1264_v32 = vpop.permute.xlu0 %1263  ;;  %1088 = vrot.lane.b32.xlu1 %v1013_v26, %s2971_s29  ;;  %v568_v26 = vshll.u32 %v298_v10, 16  ;;  %v565_v60 = vor.u32 %v564_v47, %v561_v46  ;;  %v837_v13 = vld [vmem:[%s3051_s27 + $0x18] sm:$0xe]  ;;  %v2685_v31 = vld [vmem:[%s3051_s27 + $0x88] sm:$0xf] }
  0xc8   : > { %1348 = vst.msk [vmem:[#allocation2 + $0x30] sm:$0xf] %vm1335_vm9, %v1264_v32  ;;  %v2108_v52 = vsel %vm3053_vm2, %v2106_v35, %v2107_v36  ;;  %v2608_v22 = vrot.slane %v837_v13, 9  ;;  %v2662_v49 = vld [vmem:[%s3051_s27 + $0x2c] sm:$0x1] }
  0xc9   : > { %1086 = vrot.lane.b32.xlu0 %v1010_v29, %s2971_s29  ;;  %v1298_v41 = vpop.permute.xlu1 %1297  ;;  %v372_v29 = vrot.slane %v370_v9, 5  ;;  %v3596_v40 = vrot.slane %v568_v26, 5  ;;  %v566_v8 = vrot.slane %v565_v60, 4  ;;  %v839_v9 = vld [vmem:[%s3051_s27 + $0x20] sm:$0x1] }
  0xca   : > { %1365 = vst.msk [vmem:[#allocation2 + $0x74] sm:$0xf] %vm1335_vm9, %v1298_v41  ;;  %v574_v41 = vrot.slane %v572_v23, 4  ;;  %v949_v18 = vrot.slane %v839_v9, 5  ;;  %v861_v26 = vld [vmem:[%s3051_s27 + $0x78] sm:$0xe] }
  0xcb   : > { %v1296_v44 = vpop.permute.xlu0 %1295  ;;  %1253 = vrot.lane.b32.xlu1 %v2629_v37, %s2970_s28  ;;  %v2761_v37 = vrot.slane %v2735_v21, 9  ;;  %v571_v21 = vsel %vm3087_vm5, %v566_v8, %v3596_v40  ;;  %v2660_v23 = vld [vmem:[%s3051_s27 + $0x24] sm:$0xf]  ;;  %v2616_v35 = vrot.slane %v861_v26, 9  ;;  %v2686_v60 = vld [vmem:[%s3051_s27 + $0x8c] sm:$0x1] }
  0xcc   : > { %1364 = vst.msk [vmem:[#allocation2 + $0x70] sm:$0xf] %vm1335_vm9, %v1296_v44  ;;  %v373_v44 = vor.u32 %v372_v29, %v369_v28  ;;  %v575_v55 = vor.u32 %v574_v41, %v3596_v40  ;;  %v1005_v28 = vrot.slane %v863_v19, 5  ;;  %v1465_v36 = vshrl.u32 %v2660_v23, 16  ;;  %v3678_v5 = vld [vmem:[%s3051_s27 + $0x28] sm:$0xf] }
  0xcd   : > { %1251 = vrot.lane.b32.xlu0 %v2628_v42, %s2970_s28  ;;  %v1827_v53 = vpop.permute.xlu1 %1826  ;;  %v2105_v58 = vsel %vm3053_vm2, %v2761_v37, %v2104_v20  ;;  %v1468_v37 = vshll.u32 %v2660_v23, 16  ;;  %v1670_v40 = vshrl.u32 %v2685_v31, 16  ;;  %v1003_v47 = vsel %vm3053_vm2, %v2616_v35, %v1002_v14  ;;  %v271_v13 = vld [vmem:[%s3051_s27 + $0x10] sm:$0xf] }
  0xce   : > { %1910 = vst.msk [vmem:[#allocation2 + $0x34] sm:$0xf] %vm1896_vm10, %v1827_v53  ;;  %v384_v53 = vrot.slane %v383_v38, 4  ;;  %v374_v59 = vrot.slane %v373_v44, 4  ;;  %v576_v2 = vrot.slane %v575_v55, 4  ;;  %v356_v26 = vshrl.u32 %v271_v13, 16 }
  0xcf   : > { %v1825_v57 = vpop.permute.xlu0 %1824  ;;  %1285 = vrot.lane.b32.xlu1 %v2645_v50, %s2970_s28  ;;  %v1470_v51 = vrot.slane %v1468_v37, 5  ;;  %v2734_v37 = vld [vmem:[%s3051_s27 + $0x8c] sm:$0x1] }
  0xd0   : > { %1909 = vst.msk [vmem:[#allocation2 + $0x30] sm:$0xf] %vm1896_vm10, %v1825_v57 }
  0xd1   : > { %1283 = vrot.lane.b32.xlu0 %v2644_v54, %s2970_s28  ;;  %v1859_v6 = vpop.permute.xlu1 %1858  ;;  %v388_v54 = vrot.slane %v386_v39, 5  ;;  %v1666_v39 = vshll.u32 %v2685_v31, 16 }
  0xd2   : > { %1926 = vst.msk [vmem:[#allocation2 + $0x74] sm:$0xf] %vm1896_vm10, %v1859_v6 }
  0xd3   : > { %v1857_v11 = vpop.permute.xlu0 %1856  ;;  %1814 = vrot.lane.b32.xlu1 %v1511_v1, %s2973_s3  ;;  %v389_v63 = vsel %vm3087_vm5, %v384_v53, %v388_v54  ;;  %v3666_v53 = vrot.slane %v1666_v39, 5  ;;  %v1672_v54 = vrot.slane %v1670_v40, 4  ;;  %v2732_v39 = vld [vmem:[%s3051_s27 + $0x84] sm:$0xe]  ;;  %v272_v40 = vld [vmem:[%s3051_s27 + $0x14] sm:$0x1] }
  0xd4   : > { %1925 = vst.msk [vmem:[#allocation2 + $0x70] sm:$0xf] %vm1896_vm10, %v1857_v11 }
  0xd5   : > { %1812 = vrot.lane.b32.xlu0 %v1501_v7, %s2973_s3  ;;  %v2164_v27 = vpop.permute.xlu1 %2163  ;;  %v379_v7 = vsel %vm3087_vm5, %v374_v59, %v3583_v24  ;;  %v2661_v24 = vld [vmem:[%s3051_s27 + $0x28] sm:$0xf]  ;;  %v1484_v59 = vshll.u32 %v2662_v49, 16 }
  0xd6   : > { %2247 = vst.msk [vmem:[#allocation2 + $0x34] sm:$0xf] %vm2233_vm11, %v2164_v27  ;;  %v1004_v27 = vrot.slane %v1002_v14, 4  ;;  %v1474_v12 = vshll.u32 %v2661_v24, 16  ;;  %v1478_v30 = vshrl.u32 %v2661_v24, 16 }
  0xd7   : > { %v2162_v32 = vpop.permute.xlu0 %2161  ;;  %1846 = vrot.lane.b32.xlu1 %v1703_v16, %s2973_s3  ;;  %v581_v16 = vsel %vm3087_vm5, %v576_v2, %v580_v3  ;;  %v1673_v2 = vor.u32 %v1672_v54, %v3666_v53  ;;  %v1676_v3 = vshll.u32 %v2686_v60, 16  ;;  %v1486_v8 = vrot.slane %v1484_v59, 5  ;;  %v3695_v24 = vld [vmem:[%s3051_s27 + $0x88] sm:$0xf] }
  0xd8   : > { %2246 = vst.msk [vmem:[#allocation2 + $0x30] sm:$0xf] %vm2233_vm11, %v2162_v32  ;;  %v2684_v32 = vld [vmem:[%s3051_s27 + $0x84] sm:$0xf]  ;;  %v3658_v44 = vrot.slane %v1474_v12, 5  ;;  %v1480_v45 = vrot.slane %v1478_v30, 4 }
  0xd9   : > { %1844 = vrot.lane.b32.xlu0 %v1693_v17, %s2973_s3  ;;  %v2196_v42 = vpop.permute.xlu1 %2195  ;;  %v948_v17 = vrot.slane %v946_v4, 4  ;;  %v1657_v41 = vshrl.u32 %v2684_v32, 16  ;;  %v295_v12 = vld [vmem:[%s3051_s27 + $0x70] sm:$0xf]  ;;  %v362_v59 = vshll.u32 %v272_v40, 16 }
  0xda   : > { %2263 = vst.msk [vmem:[#allocation2 + $0x74] sm:$0xf] %vm2233_vm11, %v2196_v42  ;;  %v1660_v42 = vshll.u32 %v2684_v32, 16 }
  0xdb   : > { %v2194_v50 = vpop.permute.xlu0 %2193  ;;  %2151 = vrot.lane.b32.xlu1 %v2052_v34, %s2974_s4  ;;  %v950_v29 = vsel %vm3053_vm2, %v948_v17, %v949_v18  ;;  %v947_v34 = vsel %vm3053_vm2, %v2608_v22, %v946_v4  ;;  %v1659_v55 = vrot.slane %v1657_v41, 4  ;;  %v1674_v17 = vrot.slane %v1673_v2, 4  ;;  %v2708_v22 = vld [vmem:[%s3051_s27 + $0x24] sm:$0xe]  ;;  %v296_v2 = vld [vmem:[%s3051_s27 + $0x74] sm:$0x1] }
  0xdc   : > { %2262 = vst.msk [vmem:[#allocation2 + $0x70] sm:$0xf] %vm2233_vm11, %v2194_v50  ;;  %v1467_v50 = vrot.slane %v1465_v36, 4  ;;  %v1662_v56 = vrot.slane %v1660_v42, 5  ;;  %v1678_v18 = vrot.slane %v1676_v3, 5  ;;  %v2752_v36 = vrot.slane %v2708_v22, 9 }
  0xdd   : > { %2149 = vrot.lane.b32.xlu0 %v2049_v43, %s2974_s4  ;;  %v725_v57 = vpop.permute.xlu1 %724  ;;  %v1006_v43 = vsel %vm3053_vm2, %v1004_v27, %v1005_v28  ;;  %v358_v42 = vrot.slane %v356_v26, 4  ;;  %v859_v26 = vld [vmem:[%s3051_s27 + $0x70] sm:$0xf] }
  0xde   : > { %810 = vst.msk [vmem:[#allocation2 + $0x2c] sm:$0xf] %vm798_vm7, %v725_v57  ;;  %v2627_v57 = vld [vmem:[%s3051_s27 + $0x28] sm:$0xf]  ;;  %v1663_v4 = vor.u32 %v1662_v56, %v1659_v55  ;;  %v2100_v56 = vrot.slane %v2734_v37, 5 }
  0xdf   : > { %v723_v62 = vpop.permute.xlu0 %722  ;;  %2183 = vrot.lane.b32.xlu1 %v2108_v52, %s2974_s4  ;;  %v2879_v1 = vld [vmem:[#allocation2 + $0x30] sm:$0xff]  }
  0xe0   : > { %809 = vst.msk [vmem:[#allocation2 + $0x28] sm:$0xf] %vm798_vm7, %v723_v62  ;;  %v2402_v15 = vsel %vm2379_vm12, %v2879_v1, 0  ;;  %v2626_v62 = vld [vmem:[%s3051_s27 + $0x24] sm:$0xf]  ;;  %v1664_v19 = vrot.slane %v1663_v4, 4 }
  0xe1   : > { %2181 = vrot.lane.b32.xlu0 %v2105_v58, %s2974_s4  ;;  %v757_v6 = vpop.permute.xlu1 %756  ;;  %v1481_v58 = vor.u32 %v1480_v45, %v3658_v44  ;;  %v860_v37 = vld [vmem:[%s3051_s27 + $0x74] sm:$0x1] }
  0xe2   : > { %826 = vst.msk [vmem:[#allocation2 + $0x6c] sm:$0xf] %vm798_vm7, %v757_v6  ;;  %v2643_v6 = vld [vmem:[%s3051_s27 + $0x88] sm:$0xf]  ;;  %v1669_v35 = vsel %vm3087_vm5, %v1664_v19, %v3666_v53  ;;  %v204_v53 = vld [vmem:[%s3051_s27 + $0xc] sm:$0xf] }
  0xe3   : > { %v755_v10 = vpop.permute.xlu0 %754  ;;  %v2878_v11 = vld [vmem:[#allocation2 + $0x70] sm:$0xff]   ;;  %712 = vrot.lane.b32.xlu1 %v389_v63, %s2972_s30  ;;  %v1471_v63 = vor.u32 %v1470_v51, %v1467_v50  ;;  %237 = vst.msk [vmem:[#allocation2 + $0x8] sm:$0xf] %vm234_vm6, %v204_v53 }
  0xe4   : > { %825 = vst.msk [vmem:[#allocation2 + $0x68] sm:$0xf] %vm798_vm7, %v755_v10  ;;  %2808 = vmatprep.subr.msk.bf16.mxu0 %vm2379_vm12, %v2878_v11  ;;  %v2642_v10 = vld [vmem:[%s3051_s27 + $0x84] sm:$0xf]  ;;  %v205_v51 = vld [vmem:[%s3051_s27 + $0x10] sm:$0xf] }
  0xe5   : > { %710 = vrot.lane.b32.xlu0 %v379_v7, %s2972_s30  ;;  %v1065_v20 = vpop.permute.xlu1 %1064  ;;  %2792 = vmatpush3.bf16.xpose.msra.mxu0 %v2402_v15  ;;  %v1482_v7 = vrot.slane %v1481_v58, 4  ;;  %v1472_v11 = vrot.slane %v1471_v63, 4  ;;  %v2041_v15 = vrot.slane %v3678_v5, 5  ;;  %238 = vst.msk [vmem:[#allocation2 + $0xc] sm:$0xf] %vm234_vm6, %v205_v51 }
  0xe6   : > { %1150 = vst.msk [vmem:[#allocation2 + $0x2c] sm:$0xf] %vm1138_vm8, %v1065_v20  ;;  %v2710_v20 = vld [vmem:[%s3051_s27 + $0x2c] sm:$0x1]  ;;  %v221_v5 = vld [vmem:[%s3051_s27 + $0x70] sm:$0xf] }
  0xe7   : > { %v1063_v25 = vpop.permute.xlu0 %1062  ;;  %744 = vrot.lane.b32.xlu1 %v581_v16, %s2972_s30  ;;  %v270_v16 = vld [vmem:[%s3051_s27 + $0xc] sm:$0xf]  ;;  %v1477_v27 = vsel %vm3087_vm5, %v1472_v11, %v3658_v44  ;;  %v2043_v31 = vrot.slane %v2041_v15, 4  ;;  %v2044_v32 = vrot.slane %v2710_v20, 5  ;;  %v548_v44 = vshrl.u32 %v295_v12, 16 }
  0xe8   : > { %1149 = vst.msk [vmem:[#allocation2 + $0x28] sm:$0xf] %vm1138_vm8, %v1063_v25  ;;  %v352_v25 = vshll.u32 %v271_v13, 16  ;;  %v343_v28 = vshrl.u32 %v270_v16, 16  ;;  %v2042_v63 = vsel %vm3053_vm2, %v2752_v36, %v2041_v15  ;;  %v554_v13 = vshll.u32 %v296_v2, 16 }
  0xe9   : > { %742 = vrot.lane.b32.xlu0 %v571_v21, %s2972_s30  ;;  %v1097_v33 = vpop.permute.xlu1 %1096  ;;  %v1487_v21 = vsel %vm3087_vm5, %v1482_v7, %v1486_v8  ;;  %v2045_v54 = vsel %vm3053_vm2, %v2043_v31, %v2044_v32  ;;  %254 = vst.msk [vmem:[#allocation2 + $0x4c] sm:$0xf] %vm234_vm6, %v221_v5  ;;  %v220_v7 = vld [vmem:[%s3051_s27 + $0x6c] sm:$0xf]  ;;  %v995_v32 = vrot.slane %v859_v26, 5 }
  0xea   : > { %1166 = vst.msk [vmem:[#allocation2 + $0x6c] sm:$0xf] %vm1138_vm8, %v1097_v33  ;;  %v294_v33 = vld [vmem:[%s3051_s27 + $0x6c] sm:$0xf]  ;;  %v3715_v41 = vrot.slane %v352_v25, 5 }
  0xeb   : > { %v1095_v38 = vpop.permute.xlu0 %1094  ;;  %1052 = vrot.lane.b32.xlu1 %v950_v29, %s2971_s29  ;;  %v346_v29 = vshll.u32 %v270_v16, 16  ;;  %v535_v49 = vshrl.u32 %v294_v33, 16  ;;  %v538_v50 = vshll.u32 %v294_v33, 16  ;;  %253 = vst.msk [vmem:[#allocation2 + $0x48] sm:$0xf] %vm234_vm6, %v220_v7 }
  0xec   : > { %1165 = vst.msk [vmem:[#allocation2 + $0x68] sm:$0xf] %vm1138_vm8, %v1095_v38  ;;  %v2097_v38 = vrot.slane %v3695_v24, 5  ;;  %v359_v58 = vor.u32 %v358_v42, %v3715_v41  ;;  %v556_v24 = vrot.slane %v554_v13, 5  ;;  %v834_v31 = vld [vmem:[%s3051_s27 + $0xc] sm:$0xe] }
  0xed   : > { %1050 = vrot.lane.b32.xlu0 %v947_v34, %s2971_s29  ;;  %v1262_v46 = vpop.permute.xlu1 %1261  ;;  %v1679_v34 = vsel %vm3087_vm5, %v1674_v17, %v1678_v18  ;;  %v537_v3 = vrot.slane %v535_v49, 4  ;;  %v540_v4 = vrot.slane %v538_v50, 5  ;;  %v835_v18 = vld [vmem:[%s3051_s27 + $0x10] sm:$0xf]  ;;  %v2607_v40 = vrot.slane %v834_v31, 9 }
  0xee   : > { %1347 = vst.msk [vmem:[#allocation2 + $0x2c] sm:$0xf] %vm1335_vm9, %v1262_v46  ;;  %v345_v46 = vrot.slane %v343_v28, 4  ;;  %v2099_v55 = vrot.slane %v2097_v38, 4  ;;  %v939_v25 = vrot.slane %v835_v18, 5 }
  0xef   : > { %v1260_v52 = vpop.permute.xlu0 %1259  ;;  %1084 = vrot.lane.b32.xlu1 %v1006_v43, %s2971_s29  ;;  %v544_v43 = vshll.u32 %v295_v12, 16  ;;  %v541_v17 = vor.u32 %v540_v4, %v537_v3  ;;  %v2682_v51 = vld [vmem:[%s3051_s27 + $0x7c] sm:$0xf]  ;;  %v2659_v5 = vld [vmem:[%s3051_s27 + $0x20] sm:$0x1] }
  0xf0   : > { %1346 = vst.msk [vmem:[#allocation2 + $0x28] sm:$0xf] %vm1335_vm9, %v1260_v52  ;;  %v2101_v8 = vsel %vm3053_vm2, %v2099_v55, %v2100_v56  ;;  %v3810_v26 = vld [vmem:[%s3051_s27 + $0x1c] sm:$0xf]  ;;  %v268_v31 = vld [vmem:[%s3051_s27 + $0x4] sm:$0xf] }
  0xf1   : > { %1082 = vrot.lane.b32.xlu0 %v1003_v47, %s2971_s29  ;;  %v1294_v61 = vpop.permute.xlu1 %1293  ;;  %v348_v47 = vrot.slane %v346_v29, 5  ;;  %v3728_v60 = vrot.slane %v544_v43, 5  ;;  %v542_v28 = vrot.slane %v541_v17, 4  ;;  %v836_v29 = vld [vmem:[%s3051_s27 + $0x14] sm:$0x1] }
  0xf2   : > { %1363 = vst.msk [vmem:[#allocation2 + $0x6c] sm:$0xf] %vm1335_vm9, %v1294_v61  ;;  %v550_v61 = vrot.slane %v548_v44, 4  ;;  %v942_v36 = vrot.slane %v836_v29, 5  ;;  %v858_v43 = vld [vmem:[%s3051_s27 + $0x6c] sm:$0xe] }
  0xf3   : > { %v1292_v1 = vpop.permute.xlu0 %1291  ;;  %1249 = vrot.lane.b32.xlu1 %v2627_v57, %s2970_s28  ;;  %v2760_v57 = vrot.slane %v2732_v39, 9  ;;  %v547_v39 = vsel %vm3087_vm5, %v542_v28, %v3728_v60  ;;  %v2657_v44 = vld [vmem:[%s3051_s27 + $0x18] sm:$0xf]  ;;  %v2615_v55 = vrot.slane %v858_v43, 9  ;;  %v2683_v17 = vld [vmem:[%s3051_s27 + $0x80] sm:$0x1] }
  0xf4   : > { %1362 = vst.msk [vmem:[#allocation2 + $0x68] sm:$0xf] %vm1335_vm9, %v1292_v1  ;;  %v349_v1 = vor.u32 %v348_v47, %v345_v46  ;;  %v551_v11 = vor.u32 %v550_v61, %v3728_v60  ;;  %v998_v46 = vrot.slane %v860_v37, 5  ;;  %v1441_v56 = vshrl.u32 %v2657_v44, 16 }
  0xf5   : > { %1247 = vrot.lane.b32.xlu0 %v2626_v62, %s2970_s28  ;;  %v1823_v9 = vpop.permute.xlu1 %1822  ;;  %v2098_v15 = vsel %vm3053_vm2, %v2760_v57, %v2097_v38  ;;  %v1444_v57 = vshll.u32 %v2657_v44, 16  ;;  %v1646_v60 = vshrl.u32 %v2682_v51, 16  ;;  %v996_v4 = vsel %vm3053_vm2, %v2615_v55, %v995_v32 }
  0xf6   : > { %1908 = vst.msk [vmem:[#allocation2 + $0x2c] sm:$0xf] %vm1896_vm10, %v1823_v9  ;;  %v360_v9 = vrot.slane %v359_v58, 4  ;;  %v350_v16 = vrot.slane %v349_v1, 4  ;;  %v552_v22 = vrot.slane %v551_v11, 4  ;;  %v332_v43 = vshrl.u32 %v268_v31, 16 }
  0xf7   : > { %v1821_v14 = vpop.permute.xlu0 %1820  ;;  %1281 = vrot.lane.b32.xlu1 %v2643_v6, %s2970_s28  ;;  %v1446_v7 = vrot.slane %v1444_v57, 5  ;;  %v2731_v57 = vld [vmem:[%s3051_s27 + $0x80] sm:$0x1] }
  0xf8   : > { %1907 = vst.msk [vmem:[#allocation2 + $0x28] sm:$0xf] %vm1896_vm10, %v1821_v14 }
  0xf9   : > { %1279 = vrot.lane.b32.xlu0 %v2642_v10, %s2970_s28  ;;  %v1855_v23 = vpop.permute.xlu1 %1854  ;;  %v364_v10 = vrot.slane %v362_v59, 5  ;;  %v1642_v59 = vshll.u32 %v2682_v51, 16 }
  0xfa   : > { %1924 = vst.msk [vmem:[#allocation2 + $0x6c] sm:$0xf] %vm1896_vm10, %v1855_v23 }
  0xfb   : > { %v1853_v30 = vpop.permute.xlu0 %1852  ;;  %1810 = vrot.lane.b32.xlu1 %v1487_v21, %s2973_s3  ;;  %v365_v20 = vsel %vm3087_vm5, %v360_v9, %v364_v10  ;;  %v3798_v9 = vrot.slane %v1642_v59, 5  ;;  %v1648_v10 = vrot.slane %v1646_v60, 4  ;;  %v2729_v59 = vld [vmem:[%s3051_s27 + $0x78] sm:$0xe]  ;;  %v269_v60 = vld [vmem:[%s3051_s27 + $0x8] sm:$0x1] }
  0xfc   : > { %1923 = vst.msk [vmem:[#allocation2 + $0x68] sm:$0xf] %vm1896_vm10, %v1853_v30 }
  0xfd   : > { %1808 = vrot.lane.b32.xlu0 %v1477_v27, %s2973_s3  ;;  %v2160_v45 = vpop.permute.xlu1 %2159  ;;  %v355_v27 = vsel %vm3087_vm5, %v350_v16, %v3715_v41  ;;  %v2658_v41 = vld [vmem:[%s3051_s27 + $0x1c] sm:$0xf]  ;;  %v1460_v16 = vshll.u32 %v2659_v5, 16 }
  0xfe   : > { %2245 = vst.msk [vmem:[#allocation2 + $0x2c] sm:$0xf] %vm2233_vm11, %v2160_v45  ;;  %v997_v45 = vrot.slane %v995_v32, 4  ;;  %v1450_v49 = vshll.u32 %v2658_v41, 16  ;;  %v1454_v50 = vshrl.u32 %v2658_v41, 16 }
  0xff   : > { %v2158_v52 = vpop.permute.xlu0 %2157  ;;  %1842 = vrot.lane.b32.xlu1 %v1679_v34, %s2973_s3  ;;  %v557_v34 = vsel %vm3087_vm5, %v552_v22, %v556_v24  ;;  %v1649_v22 = vor.u32 %v1648_v10, %v3798_v9  ;;  %v1652_v24 = vshll.u32 %v2683_v17, 16  ;;  %v1462_v28 = vrot.slane %v1460_v16, 5  ;;  %v3827_v41 = vld [vmem:[%s3051_s27 + $0x7c] sm:$0xf] }
 0x100   : > { %2244 = vst.msk [vmem:[#allocation2 + $0x28] sm:$0xf] %vm2233_vm11, %v2158_v52  ;;  %v2681_v52 = vld [vmem:[%s3051_s27 + $0x78] sm:$0xf]  ;;  %v3790_v1 = vrot.slane %v1450_v49, 5  ;;  %v1456_v2 = vrot.slane %v1454_v50, 4 }
 0x101   : > { %1840 = vrot.lane.b32.xlu0 %v1669_v35, %s2973_s3  ;;  %v2192_v62 = vpop.permute.xlu1 %2191  ;;  %v941_v35 = vrot.slane %v939_v25, 4  ;;  %v1633_v61 = vshrl.u32 %v2681_v52, 16  ;;  %v292_v49 = vld [vmem:[%s3051_s27 + $0x64] sm:$0xf]  ;;  %v338_v16 = vshll.u32 %v269_v60, 16 }
 0x102   : > { %2261 = vst.msk [vmem:[#allocation2 + $0x6c] sm:$0xf] %vm2233_vm11, %v2192_v62  ;;  %v1636_v62 = vshll.u32 %v2681_v52, 16 }
 0x103   : > { %v2190_v6 = vpop.permute.xlu0 %2189  ;;  %2147 = vrot.lane.b32.xlu1 %v2045_v54, %s2974_s4  ;;  %v943_v47 = vsel %vm3053_vm2, %v941_v35, %v942_v36  ;;  %v940_v54 = vsel %vm3053_vm2, %v2607_v40, %v939_v25  ;;  %v1635_v11 = vrot.slane %v1633_v61, 4  ;;  %v1650_v35 = vrot.slane %v1649_v22, 4  ;;  %v2705_v40 = vld [vmem:[%s3051_s27 + $0x18] sm:$0xe]  ;;  %v293_v22 = vld [vmem:[%s3051_s27 + $0x68] sm:$0x1] }
 0x104   : > { %2260 = vst.msk [vmem:[#allocation2 + $0x68] sm:$0xf] %vm2233_vm11, %v2190_v6  ;;  %v1443_v6 = vrot.slane %v1441_v56, 4  ;;  %v1638_v13 = vrot.slane %v1636_v62, 5  ;;  %v1654_v36 = vrot.slane %v1652_v24, 5  ;;  %v2751_v56 = vrot.slane %v2705_v40, 9 }
 0x105   : > { %2145 = vrot.lane.b32.xlu0 %v2042_v63, %s2974_s4  ;;  %v721_v14 = vpop.permute.xlu1 %720  ;;  %v999_v63 = vsel %vm3053_vm2, %v997_v45, %v998_v46  ;;  %v334_v62 = vrot.slane %v332_v43, 4 }
 0x106   : > { %808 = vst.msk [vmem:[#allocation2 + $0x24] sm:$0xf] %vm798_vm7, %v721_v14  ;;  %v2625_v14 = vld [vmem:[%s3051_s27 + $0x1c] sm:$0xf]  ;;  %v1639_v25 = vor.u32 %v1638_v13, %v1635_v11  ;;  %v2093_v13 = vrot.slane %v2731_v57, 5 }
 0x107   : > { %v719_v19 = vpop.permute.xlu0 %718  ;;  %2179 = vrot.lane.b32.xlu1 %v2101_v8, %s2974_s4  ;;  %v2881_v21 = vld [vmem:[#allocation2 + $0x28] sm:$0xff]  }
 0x108   : > { %807 = vst.msk [vmem:[#allocation2 + $0x20] sm:$0xf] %vm798_vm7, %v719_v19  ;;  %v2399_v33 = vsel %vm2379_vm12, %v2881_v21, 0  ;;  %v2624_v19 = vld [vmem:[%s3051_s27 + $0x18] sm:$0xf]  ;;  %v1640_v37 = vrot.slane %v1639_v25, 4 }
 0x109   : > { %2177 = vrot.lane.b32.xlu0 %v2098_v15, %s2974_s4  ;;  %v753_v23 = vpop.permute.xlu1 %752  ;;  %v1457_v15 = vor.u32 %v1456_v2, %v3790_v1  ;;  %v857_v57 = vld [vmem:[%s3051_s27 + $0x68] sm:$0x1] }
 0x10a   : > { %824 = vst.msk [vmem:[#allocation2 + $0x64] sm:$0xf] %vm798_vm7, %v753_v23  ;;  %v2641_v23 = vld [vmem:[%s3051_s27 + $0x7c] sm:$0xf]  ;;  %v1645_v55 = vsel %vm3087_vm5, %v1640_v37, %v3798_v9  ;;  %v202_v9 = vld [vmem:[%s3051_s27] sm:$0xf] }
 0x10b   : > { %v751_v12 = vpop.permute.xlu0 %750  ;;  %v2880_v30 = vld [vmem:[#allocation2 + $0x68] sm:$0xff]   ;;  %708 = vrot.lane.b32.xlu1 %v365_v20, %s2972_s30  ;;  %v1447_v20 = vor.u32 %v1446_v7, %v1443_v6  ;;  %v203_v7 = vld [vmem:[%s3051_s27 + $0x4] sm:$0xf]  ;;  %235 = vst.msk [vmem:[#allocation2] sm:$0xf] %vm234_vm6, %v202_v9 }
 0x10c   : > { %823 = vst.msk [vmem:[#allocation2 + $0x60] sm:$0xf] %vm798_vm7, %v751_v12  ;;  %2809 = vmatprep.subr.msk.bf16.mxu0 %vm2379_vm12, %v2880_v30  ;;  %v2640_v12 = vld [vmem:[%s3051_s27 + $0x78] sm:$0xf] }
 0x10d   : > { %706 = vrot.lane.b32.xlu0 %v355_v27, %s2972_s30  ;;  %v1061_v38 = vpop.permute.xlu1 %1060  ;;  %2794 = vmatpush3.bf16.xpose.msra.mxu0 %v2399_v33  ;;  %v1458_v27 = vrot.slane %v1457_v15, 4  ;;  %v1448_v30 = vrot.slane %v1447_v20, 4  ;;  %v2034_v33 = vrot.slane %v3810_v26, 5  ;;  %236 = vst.msk [vmem:[#allocation2 + $0x4] sm:$0xf] %vm234_vm6, %v203_v7 }
 0x10e   : > { %1148 = vst.msk [vmem:[#allocation2 + $0x24] sm:$0xf] %vm1138_vm8, %v1061_v38  ;;  %v2707_v38 = vld [vmem:[%s3051_s27 + $0x20] sm:$0x1]  ;;  %v219_v26 = vld [vmem:[%s3051_s27 + $0x64] sm:$0xf] }
 0x10f   : > { %v1059_v42 = vpop.permute.xlu0 %1058  ;;  %740 = vrot.lane.b32.xlu1 %v557_v34, %s2972_s30  ;;  %v267_v34 = vld [vmem:[%s3051_s27] sm:$0xf]  ;;  %v1453_v45 = vsel %vm3087_vm5, %v1448_v30, %v3790_v1  ;;  %v2036_v51 = vrot.slane %v2034_v33, 4  ;;  %v2037_v52 = vrot.slane %v2707_v38, 5  ;;  %v524_v1 = vshrl.u32 %v292_v49, 16 }
 0x110   : > { %1147 = vst.msk [vmem:[#allocation2 + $0x20] sm:$0xf] %vm1138_vm8, %v1059_v42  ;;  %v328_v42 = vshll.u32 %v268_v31, 16  ;;  %v319_v46 = vshrl.u32 %v267_v34, 16  ;;  %v2035_v20 = vsel %vm3053_vm2, %v2751_v56, %v2034_v33  ;;  %v530_v31 = vshll.u32 %v293_v22, 16 }
 0x111   : > { %738 = vrot.lane.b32.xlu0 %v547_v39, %s2972_s30  ;;  %v1093_v53 = vpop.permute.xlu1 %1092  ;;  %v1463_v39 = vsel %vm3087_vm5, %v1458_v27, %v1462_v28  ;;  %v2038_v10 = vsel %vm3053_vm2, %v2036_v51, %v2037_v52  ;;  %252 = vst.msk [vmem:[#allocation2 + $0x44] sm:$0xf] %vm234_vm6, %v219_v26  ;;  %v218_v27 = vld [vmem:[%s3051_s27 + $0x60] sm:$0xf]  ;;  %v833_v38 = vld [vmem:[%s3051_s27 + $0x8] sm:$0x1] }
 0x112   : > { %1164 = vst.msk [vmem:[#allocation2 + $0x64] sm:$0xf] %vm1138_vm8, %v1093_v53  ;;  %v291_v53 = vld [vmem:[%s3051_s27 + $0x60] sm:$0xf]  ;;  %v3847_v61 = vrot.slane %v328_v42, 5  ;;  %v532_v42 = vrot.slane %v530_v31, 5 }
 0x113   : > { %v1091_v58 = vpop.permute.xlu0 %1090  ;;  %1048 = vrot.lane.b32.xlu1 %v943_v47, %s2971_s29  ;;  %v322_v47 = vshll.u32 %v267_v34, 16  ;;  %v511_v5 = vshrl.u32 %v291_v53, 16  ;;  %v514_v6 = vshll.u32 %v291_v53, 16  ;;  %251 = vst.msk [vmem:[#allocation2 + $0x40] sm:$0xf] %vm234_vm6, %v218_v27  ;;  %v935_v52 = vrot.slane %v833_v38, 5 }
 0x114   : > { %1163 = vst.msk [vmem:[#allocation2 + $0x60] sm:$0xf] %vm1138_vm8, %v1091_v58  ;;  %v2090_v58 = vrot.slane %v3827_v41, 5  ;;  %v335_v15 = vor.u32 %v334_v62, %v3847_v61  ;;  %v831_v51 = vld [vmem:[%s3051_s27] sm:$0xe] }
 0x115   : > { %1046 = vrot.lane.b32.xlu0 %v940_v54, %s2971_s29  ;;  %v1258_v3 = vpop.permute.xlu1 %1257  ;;  %v1655_v54 = vsel %vm3087_vm5, %v1650_v35, %v1654_v36  ;;  %v513_v24 = vrot.slane %v511_v5, 4  ;;  %v516_v25 = vrot.slane %v514_v6, 5  ;;  %v832_v36 = vld [vmem:[%s3051_s27 + $0x4] sm:$0xf]  ;;  %v2655_v62 = vld [vmem:[%s3051_s27 + $0x10] sm:$0xf] }
 0x116   : > { %1345 = vst.msk [vmem:[#allocation2 + $0x24] sm:$0xf] %vm1335_vm9, %v1258_v3  ;;  %v321_v3 = vrot.slane %v319_v46, 4  ;;  %v2092_v11 = vrot.slane %v2090_v58, 4  ;;  %v932_v43 = vrot.slane %v832_v36, 5  ;;  %v1426_v6 = vshll.u32 %v2655_v62, 16 }
 0x117   : > { %v1256_v8 = vpop.permute.xlu0 %1255  ;;  %1080 = vrot.lane.b32.xlu1 %v999_v63, %s2971_s29  ;;  %v520_v63 = vshll.u32 %v292_v49, 16  ;;  %v517_v35 = vor.u32 %v516_v25, %v513_v24  ;;  %v1430_v7 = vshrl.u32 %v2655_v62, 16  ;;  %v2656_v24 = vld [vmem:[%s3051_s27 + $0x14] sm:$0x1]  ;;  %v2702_v62 = vld [vmem:[%s3051_s27 + $0xc] sm:$0xe] }
 0x118   : > { %1344 = vst.msk [vmem:[#allocation2 + $0x20] sm:$0xf] %vm1335_vm9, %v1256_v8  ;;  %v2094_v28 = vsel %vm3053_vm2, %v2092_v11, %v2093_v13  ;;  %v934_v56 = vrot.slane %v932_v43, 4  ;;  %v2679_v13 = vld [vmem:[%s3051_s27 + $0x70] sm:$0xf] }
 0x119   : > { %1078 = vrot.lane.b32.xlu0 %v996_v4, %s2971_s29  ;;  %v1290_v18 = vpop.permute.xlu1 %1289  ;;  %v324_v4 = vrot.slane %v322_v47, 5  ;;  %v3860_v17 = vrot.slane %v520_v63, 5  ;;  %v518_v47 = vrot.slane %v517_v35, 4  ;;  %v2680_v36 = vld [vmem:[%s3051_s27 + $0x74] sm:$0x1] }
 0x11a   : > { %1361 = vst.msk [vmem:[#allocation2 + $0x64] sm:$0xf] %vm1335_vm9, %v1290_v18  ;;  %v526_v18 = vrot.slane %v524_v1, 4  ;;  %v2654_v1 = vld [vmem:[%s3051_s27 + $0xc] sm:$0xf]  ;;  %v936_v5 = vsel %vm3053_vm2, %v934_v56, %v935_v52 }
 0x11b   : > { %v1288_v21 = vpop.permute.xlu0 %1287  ;;  %1245 = vrot.lane.b32.xlu1 %v2625_v14, %s2970_s28  ;;  %v2759_v14 = vrot.slane %v2729_v59, 9  ;;  %v523_v60 = vsel %vm3087_vm5, %v518_v47, %v3860_v17  ;;  %v1420_v11 = vshll.u32 %v2654_v1, 16 }
 0x11c   : > { %1360 = vst.msk [vmem:[#allocation2 + $0x60] sm:$0xf] %vm1335_vm9, %v1288_v21  ;;  %v325_v21 = vor.u32 %v324_v4, %v321_v3  ;;  %v527_v30 = vor.u32 %v526_v18, %v3860_v17  ;;  %v991_v3 = vrot.slane %v857_v57, 5  ;;  %v1428_v18 = vrot.slane %v1426_v6, 5 }
 0x11d   : > { %1243 = vrot.lane.b32.xlu0 %v2624_v19, %s2970_s28  ;;  %v1819_v29 = vpop.permute.xlu1 %1818  ;;  %v2091_v33 = vsel %vm3053_vm2, %v2759_v14, %v2090_v58  ;;  %v855_v58 = vld [vmem:[%s3051_s27 + $0x60] sm:$0xe]  ;;  %v1422_v26 = vrot.slane %v1420_v11, 5  ;;  %v2750_v6 = vrot.slane %v2702_v62, 9 }
 0x11e   : > { %1906 = vst.msk [vmem:[#allocation2 + $0x24] sm:$0xf] %vm1896_vm10, %v1819_v29  ;;  %v336_v29 = vrot.slane %v335_v15, 4  ;;  %v326_v34 = vrot.slane %v325_v21, 4  ;;  %v528_v41 = vrot.slane %v527_v30, 4  ;;  %v2614_v4 = vrot.slane %v855_v58, 9 }
 0x11f   : > { %v1817_v32 = vpop.permute.xlu0 %1816  ;;  %1277 = vrot.lane.b32.xlu1 %v2641_v23, %s2970_s28  ;;  %v2678_v15 = vld [vmem:[%s3051_s27 + $0x6c] sm:$0xf]  ;;  %v1622_v21 = vshrl.u32 %v2679_v13, 16  ;;  %v1436_v30 = vshll.u32 %v2656_v24, 16 }
 0x120   : > { %1905 = vst.msk [vmem:[#allocation2 + $0x20] sm:$0xf] %vm1896_vm10, %v1817_v32  ;;  %v331_v46 = vsel %vm3087_vm5, %v326_v34, %v3847_v61  ;;  %v2606_v61 = vrot.slane %v831_v51, 9  ;;  %v1612_v27 = vshll.u32 %v2678_v15, 16  ;;  %v2622_v34 = vld [vmem:[%s3051_s27 + $0xc] sm:$0xf] }
 0x121   : > { %1275 = vrot.lane.b32.xlu0 %v2640_v12, %s2970_s28  ;;  %v1851_v44 = vpop.permute.xlu1 %1850  ;;  %v340_v12 = vrot.slane %v338_v16, 5 }
 0x122   : > { %1922 = vst.msk [vmem:[#allocation2 + $0x64] sm:$0xf] %vm1896_vm10, %v1851_v44  ;;  %v856_v44 = vld [vmem:[%s3051_s27 + $0x64] sm:$0xf]  ;;  %v933_v9 = vsel %vm3053_vm2, %v2606_v61, %v932_v43  ;;  %v1614_v38 = vrot.slane %v1612_v27, 5 }
 0x123   : > { %v1849_v50 = vpop.permute.xlu0 %1848  ;;  %1806 = vrot.lane.b32.xlu1 %v1463_v39, %s2973_s3  ;;  %v341_v39 = vsel %vm3087_vm5, %v336_v29, %v340_v12  ;;  %v988_v53 = vrot.slane %v856_v44, 5  ;;  %v2623_v29 = vld [vmem:[%s3051_s27 + $0x10] sm:$0xf]  ;;  %v1628_v44 = vshll.u32 %v2680_v36, 16 }
 0x124   : > { %1921 = vst.msk [vmem:[#allocation2 + $0x60] sm:$0xf] %vm1896_vm10, %v1849_v50 }
 0x125   : > { %1804 = vrot.lane.b32.xlu0 %v1453_v45, %s2973_s3  ;;  %v2156_v2 = vpop.permute.xlu1 %2155  ;;  %v989_v17 = vsel %vm3053_vm2, %v2614_v4, %v988_v53 }
 0x126   : > { %2243 = vst.msk [vmem:[#allocation2 + $0x24] sm:$0xf] %vm2233_vm11, %v2156_v2  ;;  %v990_v2 = vrot.slane %v988_v53, 4 }
 0x127   : > { %v2154_v8 = vpop.permute.xlu0 %2153  ;;  %1838 = vrot.lane.b32.xlu1 %v1655_v54, %s2973_s3 }
 0x128   : > { %2242 = vst.msk [vmem:[#allocation2 + $0x20] sm:$0xf] %vm2233_vm11, %v2154_v8  ;;  %v992_v16 = vsel %vm3053_vm2, %v990_v2, %v991_v3 }
 0x129   : > { %1836 = vrot.lane.b32.xlu0 %v1645_v55, %s2973_s3  ;;  %v2188_v19 = vpop.permute.xlu1 %2187  ;;  %v533_v55 = vsel %vm3087_vm5, %v528_v41, %v532_v42  ;;  %v1438_v42 = vrot.slane %v1436_v30, 5 }
 0x12a   : > { %2259 = vst.msk [vmem:[#allocation2 + $0x64] sm:$0xf] %vm2233_vm11, %v2188_v19  ;;  %v1432_v19 = vrot.slane %v1430_v7, 4  ;;  %v2728_v7 = vld [vmem:[%s3051_s27 + $0x74] sm:$0x1] }
 0x12b   : > { %v2186_v23 = vpop.permute.xlu0 %2185  ;;  %2143 = vrot.lane.b32.xlu1 %v2038_v10, %s2974_s4  ;;  %v1417_v10 = vshrl.u32 %v2654_v1, 16 }
 0x12c   : > { %2258 = vst.msk [vmem:[#allocation2 + $0x60] sm:$0xf] %vm2233_vm11, %v2186_v23  ;;  %v1609_v23 = vshrl.u32 %v2678_v15, 16  ;;  %v1433_v12 = vor.u32 %v1432_v19, %v1428_v18 }
 0x12d   : > { %2141 = vrot.lane.b32.xlu0 %v2035_v20, %s2974_s4  ;;  %v717_v32 = vpop.permute.xlu1 %716  ;;  %v1618_v20 = vshll.u32 %v2679_v13, 16  ;;  %v1419_v25 = vrot.slane %v1417_v10, 4  ;;  %v2086_v13 = vrot.slane %v2728_v7, 5 }
 0x12e   : > { %806 = vst.msk [vmem:[#allocation2 + $0x1c] sm:$0xf] %vm798_vm7, %v717_v32  ;;  %v1624_v32 = vrot.slane %v1622_v21, 4  ;;  %v1434_v41 = vrot.slane %v1433_v12, 4 }
 0x12f   : > { %v715_v37 = vpop.permute.xlu0 %714  ;;  %2175 = vrot.lane.b32.xlu1 %v2094_v28, %s2974_s4  ;;  %v2883_v40 = vld [vmem:[#allocation2 + $0x20] sm:$0xff]   ;;  %v1620_v31 = vrot.slane %v1618_v20, 5  ;;  %v1423_v35 = vor.u32 %v1422_v26, %v1419_v25 }
 0x130   : > { %805 = vst.msk [vmem:[#allocation2 + $0x18] sm:$0xf] %vm798_vm7, %v715_v37  ;;  %v2396_v54 = vsel %vm2379_vm12, %v2883_v40, 0  ;;  %v1611_v37 = vrot.slane %v1609_v23, 4  ;;  %v2639_v40 = vld [vmem:[%s3051_s27 + $0x70] sm:$0xf]  ;;  %v1439_v52 = vsel %vm3087_vm5, %v1434_v41, %v1438_v42 }
 0x131   : > { %2173 = vrot.lane.b32.xlu0 %v2091_v33, %s2974_s4  ;;  %v749_v45 = vpop.permute.xlu1 %748  ;;  %v1625_v43 = vor.u32 %v1624_v32, %v1620_v31  ;;  %v1424_v47 = vrot.slane %v1423_v35, 4  ;;  %v3979_v20 = vld [vmem:[%s4107_s1] sm:$0xf] }
 0x132   : > { %822 = vst.msk [vmem:[#allocation2 + $0x5c] sm:$0xf] %vm798_vm7, %v749_v45  ;;  %2805 = vmatprep.mubr.msk.bf16.mxu0 %vm2379_vm12, %v3979_v20 }
 0x133   : > { %v747_v49 = vpop.permute.xlu0 %746  ;;  %v2882_v50 = vld [vmem:[#allocation2 + $0x60] sm:$0xff]   ;;  %704 = vrot.lane.b32.xlu1 %v341_v39, %s2972_s30  ;;  %v1626_v53 = vrot.slane %v1625_v43, 4  ;;  %v1429_v57 = vsel %vm3087_vm5, %v1424_v47, %v1428_v18 }
 0x134   : > { %821 = vst.msk [vmem:[#allocation2 + $0x58] sm:$0xf] %vm798_vm7, %v747_v49  ;;  %2810 = vmatprep.subr.msk.bf16.mxu0 %vm2379_vm12, %v2882_v50  ;;  %v1615_v49 = vor.u32 %v1614_v38, %v1611_v37  ;;  %v2703_v50 = vld [vmem:[%s3051_s27 + $0x10] sm:$0xf] }
 0x135   : > { %702 = vrot.lane.b32.xlu0 %v331_v46, %s2972_s30  ;;  %v1057_v59 = vpop.permute.xlu1 %1056  ;;  %2796 = vmatpush3.bf16.xpose.msra.mxu0 %v2396_v54  ;;  %v2638_v46 = vld [vmem:[%s3051_s27 + $0x6c] sm:$0xf]  ;;  %v1630_v54 = vrot.slane %v1628_v44, 5 }
 0x136   : > { %1146 = vst.msk [vmem:[#allocation2 + $0x1c] sm:$0xf] %vm1138_vm8, %v1057_v59  ;;  %v1616_v58 = vrot.slane %v1615_v49, 4  ;;  %v2704_v59 = vld [vmem:[%s3051_s27 + $0x14] sm:$0x1] }
 0x137   : > { %v1055_v63 = vpop.permute.xlu0 %1054  ;;  %736 = vrot.lane.b32.xlu1 %v533_v55, %s2972_s30  ;;  %v2027_v55 = vrot.slane %v2703_v50, 5  ;;  %v2030_v2 = vrot.slane %v2704_v59, 5 }
 0x138   : > { %1145 = vst.msk [vmem:[#allocation2 + $0x18] sm:$0xf] %vm1138_vm8, %v1055_v63  ;;  %v1631_v63 = vsel %vm3087_vm5, %v1626_v53, %v1630_v54 }
 0x139   : > { %734 = vrot.lane.b32.xlu0 %v523_v60, %s2972_s30  ;;  %v1089_v8 = vpop.permute.xlu1 %1088  ;;  %v2727_v60 = vld [vmem:[%s3051_s27 + $0x70] sm:$0xf]  ;;  %v2029_v1 = vrot.slane %v2027_v55, 4  ;;  %v2028_v48 = vsel %vm3053_vm2, %v2750_v6, %v2027_v55 }
 0x13a   : > { %1162 = vst.msk [vmem:[#allocation2 + $0x5c] sm:$0xf] %vm1138_vm8, %v1089_v8  ;;  %v2083_v3 = vrot.slane %v2727_v60, 5 }
 0x13b   : > { %v1087_v14 = vpop.permute.xlu0 %1086  ;;  %1044 = vrot.lane.b32.xlu1 %v936_v5, %s2971_s29  ;;  %v1621_v5 = vsel %vm3087_vm5, %v1616_v58, %v1620_v31  ;;  %v2031_v10 = vsel %vm3053_vm2, %v2029_v1, %v2030_v2 }
 0x13c   : > { %1161 = vst.msk [vmem:[#allocation2 + $0x58] sm:$0xf] %vm1138_vm8, %v1087_v14  ;;  %v2085_v11 = vrot.slane %v2083_v3, 4 }
 0x13d   : > { %1042 = vrot.lane.b32.xlu0 %v933_v9, %s2971_s29  ;;  %v1254_v22 = vpop.permute.xlu1 %1253  ;;  %v2726_v9 = vld [vmem:[%s3051_s27 + $0x6c] sm:$0xe]  ;;  %s2896_s27 = sshll.u32 %s2975_s12, 4  ;;  %s2897_s27 = int_to_ptr.vmem [resolvable:$false] %s2896_s27 }
 0x13e   : > { %1343 = vst.msk [vmem:[#allocation2 + $0x1c] sm:$0xf] %vm1335_vm9, %v1254_v22  ;;  %v2758_v15 = vrot.slane %v2726_v9, 9  ;;  %p2899_p1 = scmp.lt.s32.totalorder %s4057_s16, %s2897_s27 }
 0x13f   : > { %v1252_v28 = vpop.permute.xlu0 %1251  ;;  %1076 = vrot.lane.b32.xlu1 %v992_v16, %s2971_s29 }
 0x140   : > { %1342 = vst.msk [vmem:[#allocation2 + $0x18] sm:$0xf] %vm1335_vm9, %v1252_v28  ;;  %v2084_v19 = vsel %vm3053_vm2, %v2758_v15, %v2083_v3 }
 0x141   : > { %1074 = vrot.lane.b32.xlu0 %v989_v17, %s2971_s29  ;;  %v1286_v33 = vpop.permute.xlu1 %1285  ;;  %v2087_v17 = vsel %vm3053_vm2, %v2085_v11, %v2086_v13 }
 0x142   : > { %1359 = vst.msk [vmem:[#allocation2 + $0x5c] sm:$0xf] %vm1335_vm9, %v1286_v33 }
 0x143   : > { %v1284_v39 = vpop.permute.xlu0 %1283  ;;  %1241 = vrot.lane.b32.xlu1 %v2623_v29, %s2970_s28 }
 0x144   : > { %1358 = vst.msk [vmem:[#allocation2 + $0x58] sm:$0xf] %vm1335_vm9, %v1284_v39 }
 0x145   : > { %1239 = vrot.lane.b32.xlu0 %v2622_v34, %s2970_s28  ;;  %v1815_v45 = vpop.permute.xlu1 %1814 }
 0x146   : > { %1904 = vst.msk [vmem:[#allocation2 + $0x1c] sm:$0xf] %vm1896_vm10, %v1815_v45 }
 0x147   : > { %v1813_v51 = vpop.permute.xlu0 %1812  ;;  %1273 = vrot.lane.b32.xlu1 %v2639_v40, %s2970_s28 }
 0x148   : > { %1903 = vst.msk [vmem:[#allocation2 + $0x18] sm:$0xf] %vm1896_vm10, %v1813_v51 }
 0x149   : > { %1271 = vrot.lane.b32.xlu0 %v2638_v46, %s2970_s28  ;;  %v1847_v56 = vpop.permute.xlu1 %1846  ;;  %s2898_s28 = scalar_lea.vmem %s2897_s27, 512 }
 0x14a   : > { %1920 = vst.msk [vmem:[#allocation2 + $0x5c] sm:$0xf] %vm1896_vm10, %v1847_v56  ;;  %p2900_p2 = scmp.lt.s32.totalorder %s2898_s28, %s2892_s26 }
 0x14b   : > { %v1845_v61 = vpop.permute.xlu0 %1844  ;;  %1802 = vrot.lane.b32.xlu1 %v1439_v52, %s2973_s3 }
 0x14c   : > { %1919 = vst.msk [vmem:[#allocation2 + $0x58] sm:$0xf] %vm1896_vm10, %v1845_v61  ;;  %p2901_p3 = por %p2900_p2, %p2899_p1 }
 0x14d   : > { %1800 = vrot.lane.b32.xlu0 %v1429_v57, %s2973_s3  ;;  %v2152_v4 = vpop.permute.xlu1 %2151 }
 0x14e   : > { %2241 = vst.msk [vmem:[#allocation2 + $0x1c] sm:$0xf] %vm2233_vm11, %v2152_v4  ;;  %p2902_p5 = pnand %p2901_p3, %p2895_p0 }
 0x14f   : > { %v2150_v8 = vpop.permute.xlu0 %2149  ;;  %1834 = vrot.lane.b32.xlu1 %v1631_v63, %s2973_s3 }
 0x150   : > { %2240 = vst.msk [vmem:[#allocation2 + $0x18] sm:$0xf] %vm2233_vm11, %v2150_v8 }
 0x151   : > { %1832 = vrot.lane.b32.xlu0 %v1621_v5, %s2973_s3  ;;  %v2184_v14 = vpop.permute.xlu1 %2183 }
 0x152   : > { %2257 = vst.msk [vmem:[#allocation2 + $0x5c] sm:$0xf] %vm2233_vm11, %v2184_v14 }
 0x153   : > { %v2182_v16 = vpop.permute.xlu0 %2181  ;;  %2139 = vrot.lane.b32.xlu1 %v2031_v10, %s2974_s4 }
 0x154   : > { %2256 = vst.msk [vmem:[#allocation2 + $0x58] sm:$0xf] %vm2233_vm11, %v2182_v16 }
 0x155   : > { %2137 = vrot.lane.b32.xlu0 %v2028_v48, %s2974_s4  ;;  %v713_v18 = vpop.permute.xlu1 %712 }
 0x156   : > { %804 = vst.msk [vmem:[#allocation2 + $0x14] sm:$0xf] %vm798_vm7, %v713_v18 }
 0x157   : > { %v711_v21 = vpop.permute.xlu0 %710  ;;  %2171 = vrot.lane.b32.xlu1 %v2087_v17, %s2974_s4  ;;  %v2885_v22 = vld [vmem:[#allocation2 + $0x18] sm:$0xff]  }
 0x158   : > { %803 = vst.msk [vmem:[#allocation2 + $0x10] sm:$0xf] %vm798_vm7, %v711_v21  ;;  %v2393_v26 = vsel %vm2379_vm12, %v2885_v22, 0 }
 0x159   : > { %2169 = vrot.lane.b32.xlu0 %v2084_v19, %s2974_s4  ;;  %v745_v0 = vpop.permute.xlu1 %744 }
 0x15a   : > { %820 = vst.msk [vmem:[#allocation2 + $0x54] sm:$0xf] %vm798_vm7, %v745_v0 }
 0x15b   : > { %v743_v24 = vpop.permute.xlu0 %742  ;;  %v2884_v25 = vld [vmem:[#allocation2 + $0x58] sm:$0xff]  }
 0x15c   : > { %819 = vst.msk [vmem:[#allocation2 + $0x50] sm:$0xf] %vm798_vm7, %v743_v24  ;;  %2811 = vmatprep.subr.msk.bf16.mxu0 %vm2379_vm12, %v2884_v25 }
 0x15d   : > { %v1053_v23 = vpop.permute.xlu1 %1052  ;;  %2798 = vmatpush3.bf16.xpose.msra.mxu0 %v2393_v26 }
 0x15e   : > { %1144 = vst.msk [vmem:[#allocation2 + $0x14] sm:$0xf] %vm1138_vm8, %v1053_v23 }
 0x15f   : > { %v1051_v27 = vpop.permute.xlu0 %1050 }
 0x160   : > { %1143 = vst.msk [vmem:[#allocation2 + $0x10] sm:$0xf] %vm1138_vm8, %v1051_v27 }
 0x161   : > { %v1085_v28 = vpop.permute.xlu1 %1084 }
 0x162   : > { %1160 = vst.msk [vmem:[#allocation2 + $0x54] sm:$0xf] %vm1138_vm8, %v1085_v28 }
 0x163   : > { %v1083_v29 = vpop.permute.xlu0 %1082 }
 0x164   : > { %1159 = vst.msk [vmem:[#allocation2 + $0x50] sm:$0xf] %vm1138_vm8, %v1083_v29 }
 0x165   : > { %v1250_v12 = vpop.permute.xlu1 %1249 }
 0x166   : > { %1341 = vst.msk [vmem:[#allocation2 + $0x14] sm:$0xf] %vm1335_vm9, %v1250_v12 }
 0x167   : > { %v1248_v30 = vpop.permute.xlu0 %1247 }
 0x168   : > { %1340 = vst.msk [vmem:[#allocation2 + $0x10] sm:$0xf] %vm1335_vm9, %v1248_v30 }
 0x169   : > { %v1282_v31 = vpop.permute.xlu1 %1281 }
 0x16a   : > { %1357 = vst.msk [vmem:[#allocation2 + $0x54] sm:$0xf] %vm1335_vm9, %v1282_v31 }
 0x16b   : > { %v1280_v32 = vpop.permute.xlu0 %1279 }
 0x16c   : > { %1356 = vst.msk [vmem:[#allocation2 + $0x50] sm:$0xf] %vm1335_vm9, %v1280_v32 }
 0x16d   : > { %v1811_v33 = vpop.permute.xlu1 %1810 }
 0x16e   : > { %1902 = vst.msk [vmem:[#allocation2 + $0x14] sm:$0xf] %vm1896_vm10, %v1811_v33 }
 0x16f   : > { %v1809_v34 = vpop.permute.xlu0 %1808 }
 0x170   : > { %1901 = vst.msk [vmem:[#allocation2 + $0x10] sm:$0xf] %vm1896_vm10, %v1809_v34 }
 0x171   : > { %v1843_v35 = vpop.permute.xlu1 %1842 }
 0x172   : > { %1918 = vst.msk [vmem:[#allocation2 + $0x54] sm:$0xf] %vm1896_vm10, %v1843_v35 }
 0x173   : > { %v1841_v36 = vpop.permute.xlu0 %1840 }
 0x174   : > { %1917 = vst.msk [vmem:[#allocation2 + $0x50] sm:$0xf] %vm1896_vm10, %v1841_v36 }
 0x175   : > { %v2148_v37 = vpop.permute.xlu1 %2147 }
 0x176   : > { %2239 = vst.msk [vmem:[#allocation2 + $0x14] sm:$0xf] %vm2233_vm11, %v2148_v37 }
 0x177   : > { %v2146_v38 = vpop.permute.xlu0 %2145 }
 0x178   : > { %2238 = vst.msk [vmem:[#allocation2 + $0x10] sm:$0xf] %vm2233_vm11, %v2146_v38 }
 0x179   : > { %v2180_v39 = vpop.permute.xlu1 %2179 }
 0x17a   : > { %2255 = vst.msk [vmem:[#allocation2 + $0x54] sm:$0xf] %vm2233_vm11, %v2180_v39 }
 0x17b   : > { %v2178_v40 = vpop.permute.xlu0 %2177 }
 0x17c   : > { %2254 = vst.msk [vmem:[#allocation2 + $0x50] sm:$0xf] %vm2233_vm11, %v2178_v40 }
 0x17d   : > { %v709_v41 = vpop.permute.xlu1 %708 }
 0x17e   : > { %802 = vst.msk [vmem:[#allocation2 + $0xc] sm:$0xf] %vm798_vm7, %v709_v41 }
 0x17f   : > { %v707_v42 = vpop.permute.xlu0 %706  ;;  %v2887_v43 = vld [vmem:[#allocation2 + $0x10] sm:$0xff]  }
 0x180   : > { %801 = vst.msk [vmem:[#allocation2 + $0x8] sm:$0xf] %vm798_vm7, %v707_v42  ;;  %v2390_v47 = vsel %vm2379_vm12, %v2887_v43, 0 }
 0x181   : > { %v741_v44 = vpop.permute.xlu1 %740 }
 0x182   : > { %818 = vst.msk [vmem:[#allocation2 + $0x4c] sm:$0xf] %vm798_vm7, %v741_v44 }
 0x183   : > { %v739_v45 = vpop.permute.xlu0 %738  ;;  %v2886_v46 = vld [vmem:[#allocation2 + $0x50] sm:$0xff]  }
 0x184   : > { %817 = vst.msk [vmem:[#allocation2 + $0x48] sm:$0xf] %vm798_vm7, %v739_v45  ;;  %2812 = vmatprep.subr.msk.bf16.mxu0 %vm2379_vm12, %v2886_v46 }
 0x185   : > { %v1049_v49 = vpop.permute.xlu1 %1048  ;;  %2800 = vmatpush3.bf16.xpose.msra.mxu0 %v2390_v47 }
 0x186   : > { %1142 = vst.msk [vmem:[#allocation2 + $0xc] sm:$0xf] %vm1138_vm8, %v1049_v49 }
 0x187   : > { %v1047_v50 = vpop.permute.xlu0 %1046 }
 0x188   : > { %1141 = vst.msk [vmem:[#allocation2 + $0x8] sm:$0xf] %vm1138_vm8, %v1047_v50 }
 0x189   : > { %v1081_v51 = vpop.permute.xlu1 %1080 }
 0x18a   : > { %1158 = vst.msk [vmem:[#allocation2 + $0x4c] sm:$0xf] %vm1138_vm8, %v1081_v51 }
 0x18b   : > { %v1079_v52 = vpop.permute.xlu0 %1078 }
 0x18c   : > { %1157 = vst.msk [vmem:[#allocation2 + $0x48] sm:$0xf] %vm1138_vm8, %v1079_v52 }
 0x18d   : > { %v1246_v53 = vpop.permute.xlu1 %1245 }
 0x18e   : > { %1339 = vst.msk [vmem:[#allocation2 + $0xc] sm:$0xf] %vm1335_vm9, %v1246_v53 }
 0x18f   : > { %v1244_v54 = vpop.permute.xlu0 %1243 }
 0x190   : > { %1338 = vst.msk [vmem:[#allocation2 + $0x8] sm:$0xf] %vm1335_vm9, %v1244_v54 }
 0x191   : > { %v1278_v55 = vpop.permute.xlu1 %1277 }
 0x192   : > { %1355 = vst.msk [vmem:[#allocation2 + $0x4c] sm:$0xf] %vm1335_vm9, %v1278_v55 }
 0x193   : > { %v1276_v56 = vpop.permute.xlu0 %1275 }
 0x194   : > { %1354 = vst.msk [vmem:[#allocation2 + $0x48] sm:$0xf] %vm1335_vm9, %v1276_v56 }
 0x195   : > { %v1807_v57 = vpop.permute.xlu1 %1806 }
 0x196   : > { %1900 = vst.msk [vmem:[#allocation2 + $0xc] sm:$0xf] %vm1896_vm10, %v1807_v57 }
 0x197   : > { %v1805_v58 = vpop.permute.xlu0 %1804 }
 0x198   : > { %1899 = vst.msk [vmem:[#allocation2 + $0x8] sm:$0xf] %vm1896_vm10, %v1805_v58 }
 0x199   : > { %v1839_v59 = vpop.permute.xlu1 %1838 }
 0x19a   : > { %1916 = vst.msk [vmem:[#allocation2 + $0x4c] sm:$0xf] %vm1896_vm10, %v1839_v59 }
 0x19b   : > { %v1837_v60 = vpop.permute.xlu0 %1836 }
 0x19c   : > { %1915 = vst.msk [vmem:[#allocation2 + $0x48] sm:$0xf] %vm1896_vm10, %v1837_v60 }
 0x19d   : > { %v2144_v61 = vpop.permute.xlu1 %2143 }
 0x19e   : > { %2237 = vst.msk [vmem:[#allocation2 + $0xc] sm:$0xf] %vm2233_vm11, %v2144_v61 }
 0x19f   : > { %v2142_v62 = vpop.permute.xlu0 %2141 }
 0x1a0   : > { %2236 = vst.msk [vmem:[#allocation2 + $0x8] sm:$0xf] %vm2233_vm11, %v2142_v62 }
 0x1a1   : > { %v2176_v63 = vpop.permute.xlu1 %2175 }
 0x1a2   : > { %2253 = vst.msk [vmem:[#allocation2 + $0x4c] sm:$0xf] %vm2233_vm11, %v2176_v63 }
 0x1a3   : > { %v2174_v1 = vpop.permute.xlu0 %2173 }
 0x1a4   : > { %2252 = vst.msk [vmem:[#allocation2 + $0x48] sm:$0xf] %vm2233_vm11, %v2174_v1 }
 0x1a5   : > { %v705_v2 = vpop.permute.xlu1 %704 }
 0x1a6   : > { %800 = vst.msk [vmem:[#allocation2 + $0x4] sm:$0xf] %vm798_vm7, %v705_v2 }
 0x1a7   : > { %v703_v3 = vpop.permute.xlu0 %702  ;;  %v2889_v4 = vld [vmem:[#allocation2 + $0x8] sm:$0xff]  }
 0x1a8   : > { %799 = vst.msk [vmem:[#allocation2] sm:$0xf] %vm798_vm7, %v703_v3  ;;  %v2387_v8 = vsel %vm2379_vm12, %v2889_v4, 0 }
 0x1a9   : > { %v737_v5 = vpop.permute.xlu1 %736 }
 0x1aa   : > { %816 = vst.msk [vmem:[#allocation2 + $0x44] sm:$0xf] %vm798_vm7, %v737_v5 }
 0x1ab   : > { %v735_v6 = vpop.permute.xlu0 %734  ;;  %v2888_v7 = vld [vmem:[#allocation2 + $0x48] sm:$0xff]  }
 0x1ac   : > { %815 = vst.msk [vmem:[#allocation2 + $0x40] sm:$0xf] %vm798_vm7, %v735_v6  ;;  %2813 = vmatprep.subr.msk.bf16.mxu0 %vm2379_vm12, %v2888_v7 }
 0x1ad   : > { %v1045_v9 = vpop.permute.xlu1 %1044  ;;  %2802 = vmatpush3.bf16.xpose.msra.mxu0 %v2387_v8 }
 0x1ae   : > { %1140 = vst.msk [vmem:[#allocation2 + $0x4] sm:$0xf] %vm1138_vm8, %v1045_v9 }
 0x1af   : > { %v1043_v10 = vpop.permute.xlu0 %1042 }
 0x1b0   : > { %1139 = vst.msk [vmem:[#allocation2] sm:$0xf] %vm1138_vm8, %v1043_v10 }
 0x1b1   : > { %v1077_v11 = vpop.permute.xlu1 %1076 }
 0x1b2   : > { %1156 = vst.msk [vmem:[#allocation2 + $0x44] sm:$0xf] %vm1138_vm8, %v1077_v11 }
 0x1b3   : > { %v1075_v13 = vpop.permute.xlu0 %1074 }
 0x1b4   : > { %1155 = vst.msk [vmem:[#allocation2 + $0x40] sm:$0xf] %vm1138_vm8, %v1075_v13 }
 0x1b5   : > { %v1242_v14 = vpop.permute.xlu1 %1241 }
 0x1b6   : > { %1337 = vst.msk [vmem:[#allocation2 + $0x4] sm:$0xf] %vm1335_vm9, %v1242_v14 }
 0x1b7   : > { %v1240_v48 = vpop.permute.xlu0 %1239 }
 0x1b8   : > { %1336 = vst.msk [vmem:[#allocation2] sm:$0xf] %vm1335_vm9, %v1240_v48 }
 0x1b9   : > { %v1274_v15 = vpop.permute.xlu1 %1273 }
 0x1ba   : > { %1353 = vst.msk [vmem:[#allocation2 + $0x44] sm:$0xf] %vm1335_vm9, %v1274_v15 }
 0x1bb   : > { %v1272_v16 = vpop.permute.xlu0 %1271 }
 0x1bc   : > { %1352 = vst.msk [vmem:[#allocation2 + $0x40] sm:$0xf] %vm1335_vm9, %v1272_v16 }
 0x1bd   : > { %v1803_v17 = vpop.permute.xlu1 %1802 }
 0x1be   : > { %1898 = vst.msk [vmem:[#allocation2 + $0x4] sm:$0xf] %vm1896_vm10, %v1803_v17 }
 0x1bf   : > { %v1801_v18 = vpop.permute.xlu0 %1800 }
 0x1c0   : > { %1897 = vst.msk [vmem:[#allocation2] sm:$0xf] %vm1896_vm10, %v1801_v18 }
 0x1c1   : > { %v1835_v19 = vpop.permute.xlu1 %1834 }
 0x1c2   : > { %1914 = vst.msk [vmem:[#allocation2 + $0x44] sm:$0xf] %vm1896_vm10, %v1835_v19 }
 0x1c3   : > { %v1833_v21 = vpop.permute.xlu0 %1832 }
 0x1c4   : > { %1913 = vst.msk [vmem:[#allocation2 + $0x40] sm:$0xf] %vm1896_vm10, %v1833_v21 }
 0x1c5   : > { %v2140_v22 = vpop.permute.xlu1 %2139 }
 0x1c6   : > { %2235 = vst.msk [vmem:[#allocation2 + $0x4] sm:$0xf] %vm2233_vm11, %v2140_v22 }
 0x1c7   : > { %v2138_v0 = vpop.permute.xlu0 %2137 }
 0x1c8   : > { %2234 = vst.msk [vmem:[#allocation2] sm:$0xf] %vm2233_vm11, %v2138_v0 }
 0x1c9   : > { %v2172_v24 = vpop.permute.xlu1 %2171 }
 0x1ca   : > { %2251 = vst.msk [vmem:[#allocation2 + $0x44] sm:$0xf] %vm2233_vm11, %v2172_v24 }
 0x1cb   : > { %v2170_v25 = vpop.permute.xlu0 %2169 }
 0x1cc   : > { %2250 = vst.msk [vmem:[#allocation2 + $0x40] sm:$0xf] %vm2233_vm11, %v2170_v25 }
 0x1cf   : > { %v2891_v26 = vld [vmem:[#allocation2] sm:$0xff]  }
 0x1d0   : > { %v2384_v27 = vsel %vm2379_vm12, %v2891_v26, 0 }
 0x1d3   : > { %v2890_v23 = vld [vmem:[#allocation2 + $0x40] sm:$0xff]  }
 0x1d4   : > { %2814 = vmatprep.subr.msk.bf16.mxu0 %vm2379_vm12, %v2890_v23 }
 0x1d5   : > { %2804 = vmatpush3.bf16.xpose.msra.mxu0 %v2384_v27 }
 0x1dc   : > { %2806 = vmatmul.mubr.msk.bf16.vlgmr.msra.gmra.mxu0 %vm2379_vm12, %v3979_v20 }
 0x29c   : > { %v2465_v28 = vpop.f32.mrf.mxu0 }
 0x29d   : > { %2472 = vst [vmem:[%s182_s15] sm:$0xff] %v2465_v28 }
 0x29e   : > { %v2467_v29 = vpop.f32.mrf.mxu0 }
 0x29f   : > { %2473 = vst [vmem:[%s182_s15 + $0x8] sm:$0xff] %v2467_v29 }
 0x2a0   : > { %v2469_v20 = vpop.f32.mrf.mxu0 }
 0x2a1   : > { %2905 = shalt.err (!%p2902_p5)
}
 0x2a2   : > { %s2906_s29 = scalar_lea.hbm %s4062_s24, 256  ;;  %s2910_s4 = scalar_lea.hbm %s4108_s2, 512 }
 0x2a3   : > { %p2907_p6 = scmp.ne.s32.totalorder %s4062_s24, %s2906_s29  ;;  %p2911_p10 = scmp.lt.s32.totalorder %s4062_s24, %s4108_s2 }
 0x2a4   : > { %p2912_p11 = scmp.lt.s32.totalorder %s2910_s4, %s2906_s29 }
 0x2a5   : > { %p2908_p7 = pnand %p2907_p6, %p3031_p4 }
 0x2a6   : > { %p2913_p12 = por %p2912_p11, %p2911_p10 }
 0x2a7   : > { %p2909_p9 = pneg %p2908_p7 }
 0x2a9   : > { %p2914_p13 = pnand %p2913_p12, %p2909_p9 }
 0x2ab   : > { %2917 = shalt.err (!%p2914_p13)
}
 0x2ac   : > { %2816 = dma.vmem_to_hbm [thread:$0]  (%p3031_p4), %s4057_s16, 256, %s4062_s24, %s2475_s25   ;;  %v2470_v12 = vpop.f32.mrf.mxu0 }
 0x2ad PF: > { %p2822_p0 = scmp.ge.s32.totalorder %s2968_s14, 2  ;;  %s2505_s7 = sand.u32 1, %s2948_s9  }
 0x2ae   : > { %s2506_s8 = scalar_lea.sflag [#allocation4], %s2505_s7 }
 0x2af   : > { %p2819_p1 = pnand %p2822_p0, %p3038_p8 }
 0x2b1   : > { %p2820_p2 = pneg %p2819_p1 }
 0x2b3   : > { %2943 = dma.done.wait (%p2820_p2), %s2506_s8, 256  }
 0x2b4   : > { %2945 = vsyncadd (%p2820_p2), %s2506_s8, 4294967040  ;;  %s15_s14 = sadd.s32 1, %s2968_s14   ;;  %s4115_s9 = smov %s2952_s10 }
 0x2b5   : > { %p12_p3 = scmp.ge.s32.totalorder %s15_s14, 4   ;;  %s4116_s10 = smov %s2956_s11 }
 0x2b6   : > { %s4117_s11 = smov %s3044_s22  ;;  %s4118_s12 = smov %s2964_s13 }
 0x2b7   : > { %s4119_s13 = smov %s4121_s17  ;;  %14 = sbr.rel (!%p12_p3) target bundleno = 4 (0x4), region = 68 }
 0x2bc   :  { %2511 = vsyncpa [#allocation4], 1 }
 0x2bd   :  { %2513 = vsyncpa [#allocation4 + $0x1], 1 }

</bundles_post_ra>
